<compile_context>
chip_gen: v7x
topology: tpu7x:2x2x1
jax: 0.10.0
libtpu: 0.0.40
codegen_flags: <defaults>
</compile_context>

<pallas_src>
import math

import jax
import jax.numpy as jnp
from jax import lax
from jax.experimental import pallas as pl
from jax.experimental.pallas import tpu as pltpu


def _make_kernel(S, TQ, num_heads, head_dim, group_size):
    H, G, hd = num_heads, group_size, head_dim
    d2 = hd // 2
    scale = 1.0 / math.sqrt(hd)
    rows = H * TQ
    lane_aligned = (hd % 128 == 0)

    def _roll_half(t):
        # roll last dim by d2; combined with the pre-signed sin table this
        # equals rotate_half(t) (the sign lives in sin_signed).
        if lane_aligned:
            return pltpu.roll(t, shift=d2, axis=t.ndim - 1)
        return jnp.concatenate([t[..., d2:], t[..., :d2]], axis=-1)

    def kernel(x_ref, cos_ref, sins_ref,
               wq_ref, bq_ref, wkv_ref, bkv_ref, wo_ref, bo_ref,
               w1_ref, b1_ref, w2_ref, b2_ref,
               out_ref, k_scr, v_scr):
        qt = pl.program_id(1)

        # ---- K/V projection + RoPE(K): once per batch element (qt == 0) ----
        @pl.when(qt == 0)
        def _():
            x_full = x_ref[0]                                   # (S, dim) bf16
            cos = cos_ref[...]                                  # (S, hd) f32
            sins = sins_ref[...]                                # (S, hd) f32 (pre-signed)
            kv = jnp.dot(x_full, wkv_ref[...],
                         preferred_element_type=jnp.float32) + bkv_ref[...]
            for g in range(G):                                  # G is small
                k_g = kv[:, g * hd:(g + 1) * hd]                # (S, hd) f32
                k_rot = k_g * cos + _roll_half(k_g) * sins
                k_scr[g] = k_rot.astype(jnp.bfloat16)
                v_scr[g] = kv[:, (G + g) * hd:(G + g + 1) * hd].astype(jnp.bfloat16)

        # ---- Q projection + RoPE for this q-row tile ----
        i0 = pl.multiple_of(qt * TQ, TQ)
        xq = x_ref[0, pl.ds(i0, TQ), :]                         # (TQ, dim) bf16
        qp = jnp.dot(xq, wq_ref[...],
                     preferred_element_type=jnp.float32) + bq_ref[...]   # (TQ, H*hd)
        cos_q = cos_ref[pl.ds(i0, TQ), :]                       # (TQ, hd) f32
        sin_q = sins_ref[pl.ds(i0, TQ), :]

        if lane_aligned:
            # single lane-split relayout; RoPE with sublane-broadcast cos/sin
            q3 = qp.reshape(TQ, H, hd)
            q3 = q3 * cos_q[:, None, :] + _roll_half(q3) * sin_q[:, None, :]
            q2 = (q3 * scale).reshape(rows, hd).astype(jnp.bfloat16)
            # q-major rows: row r -> query index r // H
            qidx = lax.broadcasted_iota(jnp.int32, (rows, S), 0) // H
        else:
            # small head_dim fallback: per-head slice + concat (head-major)
            heads = []
            for h in range(H):
                qh = qp[:, h * hd:(h + 1) * hd]                 # (TQ, hd) f32
                heads.append(qh * cos_q + _roll_half(qh) * sin_q)
            q2 = (jnp.concatenate(heads, axis=0) * scale).astype(jnp.bfloat16)
            # head-major rows: row r -> query index r % TQ
            qidx = lax.broadcasted_iota(jnp.int32, (rows, S), 0) % TQ

        # causal mask: one fused iota compare per q tile, reused over groups
        col = lax.broadcasted_iota(jnp.int32, (rows, S), 1)
        masked = col > (i0 + qidx)                              # bool (rows, S)

        # ---- attention: fori_loop over kv groups, batched over all heads ----
        def group_body(g, acc):
            k_g = k_scr[g]                                      # (S, hd) bf16
            v_g = v_scr[g]
            s = lax.dot_general(q2, k_g, (((1,), (1,)), ((), ())),
                                preferred_element_type=jnp.float32)   # (rows, S)
            s = jnp.where(masked, -jnp.inf, s)
            m = jnp.max(s, axis=-1, keepdims=True)
            p = jnp.exp(s - m)                                  # f32 softmax
            denom = jnp.sum(p, axis=-1, keepdims=True)
            o_g = jnp.dot(p.astype(jnp.bfloat16), v_g,
                          preferred_element_type=jnp.float32)   # (rows, hd)
            return acc + o_g * pl.reciprocal(denom, approx=True)

        acc = lax.fori_loop(0, G, group_body,
                            jnp.zeros((rows, hd), jnp.float32))

        # heads back along the feature axis -> (TQ, dim)
        if lane_aligned:
            attn = acc.reshape(TQ, H * hd)
        else:
            attn = jnp.concatenate(
                [acc[h * TQ:(h + 1) * TQ, :] for h in range(H)], axis=1)

        # ---- o_proj + ar_proj (Linear -> SiLU -> Linear) ----
        o = jnp.dot(attn.astype(jnp.bfloat16), wo_ref[...],
                    preferred_element_type=jnp.float32) + bo_ref[...]
        h1 = jnp.dot(o.astype(jnp.bfloat16), w1_ref[...],
                     preferred_element_type=jnp.float32) + b1_ref[...]
        h1 = h1 * jax.nn.sigmoid(h1)                            # SiLU in f32
        y = jnp.dot(h1.astype(jnp.bfloat16), w2_ref[...],
                    preferred_element_type=jnp.float32) + b2_ref[...]
        out_ref[0] = y.astype(out_ref.dtype)

    return kernel


def _vmem_limit_bytes():
    # generation-aware VMEM budget: ~80% of physical, capped below the
    # v5e/v6e 128 MiB (leaves headroom for compiler-internal scratch).
    try:
        cap = int(getattr(pltpu.get_tpu_info(), "vmem_capacity_bytes", 0))
    except Exception:
        cap = 0
    if cap <= 0:
        cap = 128 * 1024 * 1024
    return min(int(cap * 0.8), 110 * 1024 * 1024)


def llama_semi_ar_head_forward(x, params, *, num_heads, head_dim, group_size, k):
    B, S, dim = x.shape
    assert dim == num_heads * head_dim
    f32, bf16 = jnp.float32, jnp.bfloat16
    H, G, hd = num_heads, group_size, head_dim

    # flash-style q-row tile; TQ must be a multiple of 8 or equal S
    TQ = S
    for cand in (128, 64, 32, 16, 8):
        if S % cand == 0:
            TQ = cand
            break
    nQ = S // TQ

    # rotary tables (glue, plain JAX); rotate_half sign folded into sin
    inv_freq = 1.0 / (10000.0 ** (jnp.arange(0, hd, 2, dtype=f32) / hd))
    t = jnp.arange(S, dtype=f32)
    freqs = jnp.einsum('i,j->ij', t, inv_freq)
    emb = jnp.concatenate([freqs, freqs], axis=-1)
    cos = jnp.cos(emb).astype(f32)                              # (S, hd)
    sign = jnp.where(jnp.arange(hd) < hd // 2, -1.0, 1.0).astype(f32)
    sin_signed = (jnp.sin(emb) * sign[None, :]).astype(f32)     # (S, hd)

    # fuse k/v weights; pad ar_proj output to a lane-dense multiple of 128
    n_out = k * dim
    n_pad = ((n_out + 127) // 128) * 128
    wq = params['wq'].astype(bf16)
    bq = params['bq'].astype(f32)
    wkv = jnp.concatenate([params['wk'], params['wv']], axis=1).astype(bf16)
    bkv = jnp.concatenate([params['bk'], params['bv']], axis=1).astype(f32)
    wo = params['wo'].astype(bf16)
    bo = params['bo'].astype(f32)
    w1 = params['w1'].astype(bf16)
    b1 = params['b1'].astype(f32)
    w2 = jnp.pad(params['w2'], ((0, 0), (0, n_pad - n_out))).astype(bf16)
    b2 = jnp.pad(params['b2'], ((0, 0), (0, n_pad - n_out))).astype(f32)
    xb = x.astype(bf16)

    kernel = _make_kernel(S, TQ, H, hd, G)

    # grid-invariant operands: single-buffered (constant block index)
    def const2d(a):
        return pl.BlockSpec(a.shape, lambda b, q: (0, 0),
                            pipeline_mode=pl.Buffered(1))

    in_specs = [
        pl.BlockSpec((1, S, dim), lambda b, q: (b, 0, 0)),      # x (per batch)
        const2d(cos), const2d(sin_signed),
        const2d(wq), const2d(bq),
        const2d(wkv), const2d(bkv),
        const2d(wo), const2d(bo),
        const2d(w1), const2d(b1),
        const2d(w2), const2d(b2),
    ]

    # advisory cost estimate for XLA scheduling around the custom call
    qkv_out = (H + 2 * G) * hd
    flops = 2 * B * S * (dim * qkv_out
                         + 2 * G * H * S * hd
                         + dim * dim + dim * 4 * dim + 4 * dim * n_pad)
    transcendentals = B * (G * H * S * S + S * 4 * dim + G * H * S)
    operands = (xb, cos, sin_signed, wq, bq, wkv, bkv, wo, bo, w1, b1, w2, b2)
    bytes_accessed = (sum(int(a.size) * a.dtype.itemsize for a in operands)
                      + B * S * n_pad * 2)

    out = pl.pallas_call(
        kernel,
        out_shape=jax.ShapeDtypeStruct((B, S, n_pad), bf16),
        grid=(B, nQ),
        in_specs=in_specs,
        out_specs=pl.BlockSpec((1, TQ, n_pad), lambda b, q: (b, q, 0)),
        scratch_shapes=[
            pltpu.VMEM((G, S, hd), bf16),   # RoPE'd K, per batch element
            pltpu.VMEM((G, S, hd), bf16),   # V, per batch element
        ],
        compiler_params=pltpu.CompilerParams(
            dimension_semantics=("parallel", "arbitrary"),
            vmem_limit_bytes=_vmem_limit_bytes(),
        ),
        cost_estimate=pl.CostEstimate(
            flops=int(flops),
            transcendentals=int(transcendentals),
            bytes_accessed=int(bytes_accessed)),
    )(xb, cos, sin_signed, wq, bq, wkv, bkv, wo, bo, w1, b1, w2, b2)

    return out[:, :, :n_out].astype(f32).reshape(B, S, k, dim)


# ---------------- pure-JAX reference (mirrors the PyTorch module) ----------------
def _rotate_half(x):
    d = x.shape[-1] // 2
    x1, x2 = x[..., :d], x[..., d:]
    return jnp.concatenate([-x2, x1], axis=-1)


def reference_forward(x, params, *, num_heads, head_dim, group_size, k):
    B, S, dim = x.shape
    q = (x @ params['wq'] + params['bq'][0]).reshape(B, S, num_heads, head_dim).transpose(0, 2, 1, 3)
    kk = (x @ params['wk'] + params['bk'][0]).reshape(B, S, group_size, head_dim).transpose(0, 2, 1, 3)
    vv = (x @ params['wv'] + params['bv'][0]).reshape(B, S, group_size, head_dim).transpose(0, 2, 1, 3)

    inv_freq = 1.0 / (10000.0 ** (jnp.arange(0, head_dim, 2, dtype=jnp.float32) / head_dim))
    t = jnp.arange(S, dtype=jnp.float32)
    freqs = jnp.einsum('i,j->ij', t, inv_freq)
    emb = jnp.concatenate([freqs, freqs], axis=-1)
    cos = jnp.cos(emb)[None, None, :, :]
    sin = jnp.sin(emb)[None, None, :, :]
    q = q * cos + _rotate_half(q) * sin
    kk = kk * cos + _rotate_half(kk) * sin

    scores = jnp.einsum('bhid,bgjd->bhgij', q, kk) / math.sqrt(head_dim)
    mask = jnp.triu(jnp.ones((S, S), dtype=bool), 1)
    scores = jnp.where(mask[None, None, None, :, :], -jnp.inf, scores)
    weights = jax.nn.softmax(scores, axis=-1)
    attn = jnp.einsum('bhgij,bgjd->bhid', weights, vv)
    attn = attn.transpose(0, 2, 1, 3).reshape(B, S, dim)
    o = attn @ params['wo'] + params['bo'][0]
    h1 = o @ params['w1'] + params['b1'][0]
    h1 = jax.nn.silu(h1)
    y = h1 @ params['w2'] + params['b2'][0]
    return y.reshape(B, S, k, dim)


if __name__ == "__main__":
    # small shapes consistent with the module constraints
    B, S = 2, 8
    num_heads, head_dim, group_size, k_tok = 4, 8, 2, 2
    dim = num_heads * head_dim  # 32

    key = jax.random.PRNGKey(0)
    keys = jax.random.split(key, 16)

    def w(kr, shape, scl=0.05):
        return jax.random.normal(kr, shape, dtype=jnp.float32) * scl

    params = {
        'wq': w(keys[0], (dim, num_heads * head_dim)), 'bq': w(keys[1], (1, num_heads * head_dim)),
        'wk': w(keys[2], (dim, group_size * head_dim)), 'bk': w(keys[3], (1, group_size * head_dim)),
        'wv': w(keys[4], (dim, group_size * head_dim)), 'bv': w(keys[5], (1, group_size * head_dim)),
        'wo': w(keys[6], (num_heads * head_dim, dim)), 'bo': w(keys[7], (1, dim)),
        'w1': w(keys[8], (dim, dim * 4)), 'b1': w(keys[9], (1, dim * 4)),
        'w2': w(keys[10], (dim * 4, k_tok * dim)), 'b2': w(keys[11], (1, k_tok * dim)),
    }
    x = jax.random.normal(keys[12], (B, S, dim), dtype=jnp.float32)

    out = llama_semi_ar_head_forward(
        x, params, num_heads=num_heads, head_dim=head_dim, group_size=group_size, k=k_tok)
    out = jax.block_until_ready(out)

    ref = reference_forward(
        x, params, num_heads=num_heads, head_dim=head_dim, group_size=group_size, k=k_tok)
    ref = jax.block_until_ready(ref)

    assert out.shape == (B, S, k_tok, dim)
    max_err = float(jnp.max(jnp.abs(out - ref)))
    # bf16 MXU operands, bf16 output + approx reciprocal -> bf16-appropriate tolerance
    assert jnp.allclose(out, ref, atol=1e-2, rtol=5e-2), max_err
    print("KERNEL_OK")
</pallas_src>

<mosaic_0001>
module attributes {stable_mosaic.version = 11 : i64} {
  func.func @kernel(%arg0: i32, %arg1: i32, %arg2: memref<1x8x32xbf16, #tpu.memory_space<vmem>>, %arg3: memref<8x8xf32, #tpu.memory_space<vmem>>, %arg4: memref<8x8xf32, #tpu.memory_space<vmem>>, %arg5: memref<32x32xbf16, #tpu.memory_space<vmem>>, %arg6: memref<1x32xf32, #tpu.memory_space<vmem>>, %arg7: memref<32x32xbf16, #tpu.memory_space<vmem>>, %arg8: memref<1x32xf32, #tpu.memory_space<vmem>>, %arg9: memref<32x32xbf16, #tpu.memory_space<vmem>>, %arg10: memref<1x32xf32, #tpu.memory_space<vmem>>, %arg11: memref<32x128xbf16, #tpu.memory_space<vmem>>, %arg12: memref<1x128xf32, #tpu.memory_space<vmem>>, %arg13: memref<128x128xbf16, #tpu.memory_space<vmem>>, %arg14: memref<1x128xf32, #tpu.memory_space<vmem>>, %arg15: memref<1x8x128xbf16, #tpu.memory_space<vmem>>, %arg16: memref<2x8x8xbf16, #tpu.memory_space<vmem>>, %arg17: memref<2x8x8xbf16, #tpu.memory_space<vmem>>) attributes {dimension_semantics = [#tpu.dimension_semantics<parallel>, #tpu.dimension_semantics<arbitrary>], iteration_bounds = array<i64: 2, 1>, scalar_prefetch = 0 : i64, scratch_operands = 2 : i64, tpu.core_type = #tpu.core_type<tc>, window_params = [{transform_indices = @transform_0, window_bounds = array<i64: 1, 8, 32>}, {pipeline_mode = #tpu.pipeline_mode<synchronous>, transform_indices = @transform_1, window_bounds = array<i64: 8, 8>}, {pipeline_mode = #tpu.pipeline_mode<synchronous>, transform_indices = @transform_2, window_bounds = array<i64: 8, 8>}, {pipeline_mode = #tpu.pipeline_mode<synchronous>, transform_indices = @transform_3, window_bounds = array<i64: 32, 32>}, {pipeline_mode = #tpu.pipeline_mode<synchronous>, transform_indices = @transform_4, window_bounds = array<i64: 1, 32>}, {pipeline_mode = #tpu.pipeline_mode<synchronous>, transform_indices = @transform_5, window_bounds = array<i64: 32, 32>}, {pipeline_mode = #tpu.pipeline_mode<synchronous>, transform_indices = @transform_6, window_bounds = array<i64: 1, 32>}, {pipeline_mode = #tpu.pipeline_mode<synchronous>, transform_indices = @transform_7, window_bounds = array<i64: 32, 32>}, {pipeline_mode = #tpu.pipeline_mode<synchronous>, transform_indices = @transform_8, window_bounds = array<i64: 1, 32>}, {pipeline_mode = #tpu.pipeline_mode<synchronous>, transform_indices = @transform_9, window_bounds = array<i64: 32, 128>}, {pipeline_mode = #tpu.pipeline_mode<synchronous>, transform_indices = @transform_10, window_bounds = array<i64: 1, 128>}, {pipeline_mode = #tpu.pipeline_mode<synchronous>, transform_indices = @transform_11, window_bounds = array<i64: 128, 128>}, {pipeline_mode = #tpu.pipeline_mode<synchronous>, transform_indices = @transform_12, window_bounds = array<i64: 1, 128>}, {transform_indices = @transform_13, window_bounds = array<i64: 1, 8, 128>}]} {
    %c0_i32 = arith.constant 0 : i32
    %0 = arith.cmpi eq, %arg1, %c0_i32 : i32
    %1 = arith.extui %0 : i1 to i32
    %c0_i32_0 = arith.constant 0 : i32
    %2 = arith.cmpi ne, %1, %c0_i32_0 : i32
    scf.if %2 {
      %c0_37 = arith.constant 0 : index
      %c0_38 = arith.constant 0 : index
      %c0_39 = arith.constant 0 : index
      %106 = vector.load %arg2[%c0_37, %c0_38, %c0_39] : memref<1x8x32xbf16, #tpu.memory_space<vmem>>, vector<1x8x32xbf16>
      %107 = vector.shape_cast %106 : vector<1x8x32xbf16> to vector<8x32xbf16>
      %c0_40 = arith.constant 0 : index
      %c0_41 = arith.constant 0 : index
      %108 = vector.load %arg3[%c0_40, %c0_41] : memref<8x8xf32, #tpu.memory_space<vmem>>, vector<8x8xf32>
      %c0_42 = arith.constant 0 : index
      %c0_43 = arith.constant 0 : index
      %109 = vector.load %arg4[%c0_42, %c0_43] : memref<8x8xf32, #tpu.memory_space<vmem>>, vector<8x8xf32>
      %c0_44 = arith.constant 0 : index
      %c0_45 = arith.constant 0 : index
      %110 = vector.load %arg7[%c0_44, %c0_45] : memref<32x32xbf16, #tpu.memory_space<vmem>>, vector<32x32xbf16>
      %cst_46 = arith.constant dense<0.000000e+00> : vector<8x32xf32>
      %111 = tpu.matmul %107, %110, %cst_46 {dimension_numbers = #tpu.dot_dimension_numbers<[1], [0], [0], [1], [0, 0, 1, 1], [], []>} : vector<8x32xbf16>, vector<32x32xbf16>, vector<8x32xf32> -> vector<8x32xf32>
      %c0_47 = arith.constant 0 : index
      %c0_48 = arith.constant 0 : index
      %112 = vector.load %arg8[%c0_47, %c0_48] : memref<1x32xf32, #tpu.memory_space<vmem>>, vector<1x32xf32>
      %113 = vector.broadcast %112 : vector<1x32xf32> to vector<8x32xf32>
      %114 = arith.addf %111, %113 : vector<8x32xf32>
      %115 = vector.extract_strided_slice %114 {offsets = [0, 0], sizes = [8, 8], strides = [1, 1]} : vector<8x32xf32> to vector<8x8xf32>
      %116 = arith.mulf %115, %108 : vector<8x8xf32>
      %117 = vector.extract_strided_slice %115 {offsets = [0, 4], sizes = [8, 4], strides = [1, 1]} : vector<8x8xf32> to vector<8x4xf32>
      %118 = vector.extract_strided_slice %115 {offsets = [0, 0], sizes = [8, 4], strides = [1, 1]} : vector<8x8xf32> to vector<8x4xf32>
      %119 = tpu.concatenate %117, %118 in 1 : vector<8x4xf32>, vector<8x4xf32> -> vector<8x8xf32>
      %120 = arith.mulf %119, %109 : vector<8x8xf32>
      %121 = arith.addf %116, %120 : vector<8x8xf32>
      %122 = arith.truncf %121 : vector<8x8xf32> to vector<8x8xbf16>
      %c0_49 = arith.constant 0 : index
      %c0_50 = arith.constant 0 : index
      %c0_51 = arith.constant 0 : index
      %123 = vector.load %arg16[%c0_49, %c0_50, %c0_51] : memref<2x8x8xbf16, #tpu.memory_space<vmem>>, vector<1x8x8xbf16>
      %124 = vector.shape_cast %123 : vector<1x8x8xbf16> to vector<8x8xbf16>
      %125 = vector.shape_cast %122 : vector<8x8xbf16> to vector<1x8x8xbf16>
      tpu.vector_store %arg16[%c0_49, %c0_50, %c0_51], %125 {strides = array<i32>} : memref<2x8x8xbf16, #tpu.memory_space<vmem>>, vector<1x8x8xbf16>,
      %126 = vector.extract_strided_slice %114 {offsets = [0, 16], sizes = [8, 8], strides = [1, 1]} : vector<8x32xf32> to vector<8x8xf32>
      %127 = arith.truncf %126 : vector<8x8xf32> to vector<8x8xbf16>
      %c0_52 = arith.constant 0 : index
      %c0_53 = arith.constant 0 : index
      %c0_54 = arith.constant 0 : index
      %128 = vector.load %arg17[%c0_52, %c0_53, %c0_54] : memref<2x8x8xbf16, #tpu.memory_space<vmem>>, vector<1x8x8xbf16>
      %129 = vector.shape_cast %128 : vector<1x8x8xbf16> to vector<8x8xbf16>
      %130 = vector.shape_cast %127 : vector<8x8xbf16> to vector<1x8x8xbf16>
      tpu.vector_store %arg17[%c0_52, %c0_53, %c0_54], %130 {strides = array<i32>} : memref<2x8x8xbf16, #tpu.memory_space<vmem>>, vector<1x8x8xbf16>,
      %131 = vector.extract_strided_slice %114 {offsets = [0, 8], sizes = [8, 8], strides = [1, 1]} : vector<8x32xf32> to vector<8x8xf32>
      %132 = arith.mulf %131, %108 : vector<8x8xf32>
      %133 = vector.extract_strided_slice %131 {offsets = [0, 4], sizes = [8, 4], strides = [1, 1]} : vector<8x8xf32> to vector<8x4xf32>
      %134 = vector.extract_strided_slice %131 {offsets = [0, 0], sizes = [8, 4], strides = [1, 1]} : vector<8x8xf32> to vector<8x4xf32>
      %135 = tpu.concatenate %133, %134 in 1 : vector<8x4xf32>, vector<8x4xf32> -> vector<8x8xf32>
      %136 = arith.mulf %135, %109 : vector<8x8xf32>
      %137 = arith.addf %132, %136 : vector<8x8xf32>
      %138 = arith.truncf %137 : vector<8x8xf32> to vector<8x8xbf16>
      %c1 = arith.constant 1 : index
      %c0_55 = arith.constant 0 : index
      %c0_56 = arith.constant 0 : index
      %139 = vector.load %arg16[%c1, %c0_55, %c0_56] : memref<2x8x8xbf16, #tpu.memory_space<vmem>>, vector<1x8x8xbf16>
      %140 = vector.shape_cast %139 : vector<1x8x8xbf16> to vector<8x8xbf16>
      %141 = vector.shape_cast %138 : vector<8x8xbf16> to vector<1x8x8xbf16>
      tpu.vector_store %arg16[%c1, %c0_55, %c0_56], %141 {strides = array<i32>} : memref<2x8x8xbf16, #tpu.memory_space<vmem>>, vector<1x8x8xbf16>,
      %142 = vector.extract_strided_slice %114 {offsets = [0, 24], sizes = [8, 8], strides = [1, 1]} : vector<8x32xf32> to vector<8x8xf32>
      %143 = arith.truncf %142 : vector<8x8xf32> to vector<8x8xbf16>
      %c1_57 = arith.constant 1 : index
      %c0_58 = arith.constant 0 : index
      %c0_59 = arith.constant 0 : index
      %144 = vector.load %arg17[%c1_57, %c0_58, %c0_59] : memref<2x8x8xbf16, #tpu.memory_space<vmem>>, vector<1x8x8xbf16>
      %145 = vector.shape_cast %144 : vector<1x8x8xbf16> to vector<8x8xbf16>
      %146 = vector.shape_cast %143 : vector<8x8xbf16> to vector<1x8x8xbf16>
      tpu.vector_store %arg17[%c1_57, %c0_58, %c0_59], %146 {strides = array<i32>} : memref<2x8x8xbf16, #tpu.memory_space<vmem>>, vector<1x8x8xbf16>,
    } else {
    }
    %c8_i32 = arith.constant 8 : i32
    %3 = arith.muli %arg1, %c8_i32 : i32
    %4 = tpu.assume_multiple %3, 8 : i32
    %c0 = arith.constant 0 : index
    %5 = arith.index_cast %4 : i32 to index
    %c0_1 = arith.constant 0 : index
    %6 = vector.load %arg2[%c0, %5, %c0_1] : memref<1x8x32xbf16, #tpu.memory_space<vmem>>, vector<1x8x32xbf16>
    %7 = vector.shape_cast %6 : vector<1x8x32xbf16> to vector<8x32xbf16>
    %c0_2 = arith.constant 0 : index
    %c0_3 = arith.constant 0 : index
    %8 = vector.load %arg5[%c0_2, %c0_3] : memref<32x32xbf16, #tpu.memory_space<vmem>>, vector<32x32xbf16>
    %cst = arith.constant dense<0.000000e+00> : vector<8x32xf32>
    %9 = tpu.matmul %7, %8, %cst {dimension_numbers = #tpu.dot_dimension_numbers<[1], [0], [0], [1], [0, 0, 1, 1], [], []>} : vector<8x32xbf16>, vector<32x32xbf16>, vector<8x32xf32> -> vector<8x32xf32>
    %c0_4 = arith.constant 0 : index
    %c0_5 = arith.constant 0 : index
    %10 = vector.load %arg6[%c0_4, %c0_5] : memref<1x32xf32, #tpu.memory_space<vmem>>, vector<1x32xf32>
    %11 = vector.broadcast %10 : vector<1x32xf32> to vector<8x32xf32>
    %12 = arith.addf %9, %11 : vector<8x32xf32>
    %13 = arith.index_cast %4 : i32 to index
    %c0_6 = arith.constant 0 : index
    %14 = vector.load %arg3[%13, %c0_6] : memref<8x8xf32, #tpu.memory_space<vmem>>, vector<8x8xf32>
    %15 = arith.index_cast %4 : i32 to index
    %c0_7 = arith.constant 0 : index
    %16 = vector.load %arg4[%15, %c0_7] : memref<8x8xf32, #tpu.memory_space<vmem>>, vector<8x8xf32>
    %17 = vector.extract_strided_slice %12 {offsets = [0, 0], sizes = [8, 8], strides = [1, 1]} : vector<8x32xf32> to vector<8x8xf32>
    %18 = arith.mulf %17, %14 : vector<8x8xf32>
    %19 = vector.extract_strided_slice %17 {offsets = [0, 4], sizes = [8, 4], strides = [1, 1]} : vector<8x8xf32> to vector<8x4xf32>
    %20 = vector.extract_strided_slice %17 {offsets = [0, 0], sizes = [8, 4], strides = [1, 1]} : vector<8x8xf32> to vector<8x4xf32>
    %21 = tpu.concatenate %19, %20 in 1 : vector<8x4xf32>, vector<8x4xf32> -> vector<8x8xf32>
    %22 = arith.mulf %21, %16 : vector<8x8xf32>
    %23 = arith.addf %18, %22 : vector<8x8xf32>
    %24 = vector.extract_strided_slice %12 {offsets = [0, 8], sizes = [8, 8], strides = [1, 1]} : vector<8x32xf32> to vector<8x8xf32>
    %25 = arith.mulf %24, %14 : vector<8x8xf32>
    %26 = vector.extract_strided_slice %24 {offsets = [0, 4], sizes = [8, 4], strides = [1, 1]} : vector<8x8xf32> to vector<8x4xf32>
    %27 = vector.extract_strided_slice %24 {offsets = [0, 0], sizes = [8, 4], strides = [1, 1]} : vector<8x8xf32> to vector<8x4xf32>
    %28 = tpu.concatenate %26, %27 in 1 : vector<8x4xf32>, vector<8x4xf32> -> vector<8x8xf32>
    %29 = arith.mulf %28, %16 : vector<8x8xf32>
    %30 = arith.addf %25, %29 : vector<8x8xf32>
    %31 = vector.extract_strided_slice %12 {offsets = [0, 16], sizes = [8, 8], strides = [1, 1]} : vector<8x32xf32> to vector<8x8xf32>
    %32 = arith.mulf %31, %14 : vector<8x8xf32>
    %33 = vector.extract_strided_slice %31 {offsets = [0, 4], sizes = [8, 4], strides = [1, 1]} : vector<8x8xf32> to vector<8x4xf32>
    %34 = vector.extract_strided_slice %31 {offsets = [0, 0], sizes = [8, 4], strides = [1, 1]} : vector<8x8xf32> to vector<8x4xf32>
    %35 = tpu.concatenate %33, %34 in 1 : vector<8x4xf32>, vector<8x4xf32> -> vector<8x8xf32>
    %36 = arith.mulf %35, %16 : vector<8x8xf32>
    %37 = arith.addf %32, %36 : vector<8x8xf32>
    %38 = vector.extract_strided_slice %12 {offsets = [0, 24], sizes = [8, 8], strides = [1, 1]} : vector<8x32xf32> to vector<8x8xf32>
    %39 = arith.mulf %38, %14 : vector<8x8xf32>
    %40 = vector.extract_strided_slice %38 {offsets = [0, 4], sizes = [8, 4], strides = [1, 1]} : vector<8x8xf32> to vector<8x4xf32>
    %41 = vector.extract_strided_slice %38 {offsets = [0, 0], sizes = [8, 4], strides = [1, 1]} : vector<8x8xf32> to vector<8x4xf32>
    %42 = tpu.concatenate %40, %41 in 1 : vector<8x4xf32>, vector<8x4xf32> -> vector<8x8xf32>
    %43 = arith.mulf %42, %16 : vector<8x8xf32>
    %44 = arith.addf %39, %43 : vector<8x8xf32>
    %45 = tpu.concatenate %23, %30, %37, %44 in 0 : vector<8x8xf32>, vector<8x8xf32>, vector<8x8xf32>, vector<8x8xf32> -> vector<32x8xf32>
    %cst_8 = arith.constant 0.353553385 : f32
    %46 = vector.broadcast %cst_8 : f32 to vector<32x8xf32>
    %47 = arith.mulf %45, %46 : vector<32x8xf32>
    %48 = arith.truncf %47 : vector<32x8xf32> to vector<32x8xbf16>
    %49 = tpu.iota {dimensions = array<i32: 0>} : vector<32x8xi32>
    %c8_i32_9 = arith.constant 8 : i32
    %c0_i32_10 = arith.constant 0 : i32
    %50 = arith.cmpi eq, %c8_i32_9, %c0_i32_10 : i32
    %c1_i32 = arith.constant 1 : i32
    %51 = arith.select %50, %c1_i32, %c8_i32_9 : i32
    %52 = vector.broadcast %51 : i32 to vector<32x8xi32>
    %53 = arith.remsi %49, %52 : vector<32x8xi32>
    %c0_i32_11 = arith.constant 0 : i32
    %54 = vector.broadcast %c0_i32_11 : i32 to vector<32x8xi32>
    %55 = arith.cmpi ne, %53, %54 : vector<32x8xi32>
    %c0_i32_12 = arith.constant 0 : i32
    %56 = vector.broadcast %c0_i32_12 : i32 to vector<32x8xi32>
    %57 = arith.cmpi slt, %53, %56 : vector<32x8xi32>
    %c0_i32_13 = arith.constant 0 : i32
    %58 = arith.cmpi slt, %51, %c0_i32_13 : i32
    %59 = vector.broadcast %58 : i1 to vector<32x8xi1>
    %60 = vector.broadcast %59 : vector<32x8xi1> to vector<32x8xi1>
    %61 = arith.xori %57, %60 : vector<32x8xi1>
    %62 = arith.andi %61, %55 : vector<32x8xi1>
    %63 = vector.broadcast %51 : i32 to vector<32x8xi32>
    %64 = arith.addi %53, %63 : vector<32x8xi32>
    %65 = arith.select %62, %64, %53 : vector<32x8xi1>, vector<32x8xi32>
    %66 = tpu.iota {dimensions = array<i32: 1>} : vector<32x8xi32>
    %67 = vector.broadcast %4 : i32 to vector<32x8xi32>
    %68 = arith.addi %67, %65 : vector<32x8xi32>
    %69 = arith.cmpi sgt, %66, %68 : vector<32x8xi32>
    %cst_14 = arith.constant 0.000000e+00 : f32
    %70 = vector.broadcast %cst_14 : f32 to vector<32x8xf32>
    %c0_i32_15 = arith.constant 0 : i32
    %c2_i32 = arith.constant 2 : i32
    %71 = arith.addi %c0_i32_15, %c2_i32 : i32
    %c1_i32_16 = arith.constant 1 : i32
    %72 = scf.for %arg18 = %c0_i32_15 to %71 step %c1_i32_16 iter_args(%arg19 = %70) -> (vector<32x8xf32>)  : i32 {
      %106 = arith.index_cast %arg18 : i32 to index
      %c0_37 = arith.constant 0 : index
      %c0_38 = arith.constant 0 : index
      %107 = vector.load %arg16[%106, %c0_37, %c0_38] : memref<2x8x8xbf16, #tpu.memory_space<vmem>>, vector<1x8x8xbf16>
      %108 = vector.shape_cast %107 : vector<1x8x8xbf16> to vector<8x8xbf16>
      %109 = arith.index_cast %arg18 : i32 to index
      %c0_39 = arith.constant 0 : index
      %c0_40 = arith.constant 0 : index
      %110 = vector.load %arg17[%109, %c0_39, %c0_40] : memref<2x8x8xbf16, #tpu.memory_space<vmem>>, vector<1x8x8xbf16>
      %111 = vector.shape_cast %110 : vector<1x8x8xbf16> to vector<8x8xbf16>
      %cst_41 = arith.constant dense<0.000000e+00> : vector<32x8xf32>
      %112 = tpu.matmul %48, %108, %cst_41 {dimension_numbers = #tpu.dot_dimension_numbers<[1], [1], [0], [0], [0, 0, 1, 0], [], []>} : vector<32x8xbf16>, vector<8x8xbf16>, vector<32x8xf32> -> vector<32x8xf32>
      %cst_42 = arith.constant 0xFF800000 : f32
      %113 = vector.broadcast %cst_42 : f32 to vector<32x8xf32>
      %114 = arith.select %69, %113, %112 : vector<32x8xi1>, vector<32x8xf32>
      %cst_43 = arith.constant dense<0xFF800000> : vector<32xf32>
      %115 = vector.multi_reduction <maximumf>, %114, %cst_43 [1] : vector<32x8xf32> to vector<32xf32>
      %116 = vector.shape_cast %115 : vector<32xf32> to vector<32x1xf32>
      %117 = vector.broadcast %116 : vector<32x1xf32> to vector<32x8xf32>
      %118 = arith.subf %114, %117 : vector<32x8xf32>
      %119 = math.exp %118 : vector<32x8xf32>
      %cst_44 = arith.constant dense<0.000000e+00> : vector<32xf32>
      %120 = vector.multi_reduction <add>, %119, %cst_44 [1] : vector<32x8xf32> to vector<32xf32>
      %121 = vector.shape_cast %120 : vector<32xf32> to vector<32x1xf32>
      %122 = arith.truncf %119 : vector<32x8xf32> to vector<32x8xbf16>
      %cst_45 = arith.constant dense<0.000000e+00> : vector<32x8xf32>
      %123 = tpu.matmul %122, %111, %cst_45 {dimension_numbers = #tpu.dot_dimension_numbers<[1], [0], [0], [1], [0, 0, 1, 1], [], []>} : vector<32x8xbf16>, vector<8x8xbf16>, vector<32x8xf32> -> vector<32x8xf32>
      %124 = tpu.reciprocal %121 {approx = true} : vector<32x1xf32> -> vector<32x1xf32>
      %125 = vector.broadcast %124 : vector<32x1xf32> to vector<32x8xf32>
      %126 = arith.mulf %123, %125 : vector<32x8xf32>
      %127 = arith.addf %arg19, %126 : vector<32x8xf32>
      scf.yield %127 : vector<32x8xf32>
    }
    %c2_i32_17 = arith.constant 2 : i32
    %73 = vector.extract_strided_slice %72 {offsets = [0, 0], sizes = [8, 8], strides = [1, 1]} : vector<32x8xf32> to vector<8x8xf32>
    %74 = vector.extract_strided_slice %72 {offsets = [8, 0], sizes = [8, 8], strides = [1, 1]} : vector<32x8xf32> to vector<8x8xf32>
    %75 = vector.extract_strided_slice %72 {offsets = [16, 0], sizes = [8, 8], strides = [1, 1]} : vector<32x8xf32> to vector<8x8xf32>
    %76 = vector.extract_strided_slice %72 {offsets = [24, 0], sizes = [8, 8], strides = [1, 1]} : vector<32x8xf32> to vector<8x8xf32>
    %77 = tpu.concatenate %73, %74, %75, %76 in 1 : vector<8x8xf32>, vector<8x8xf32>, vector<8x8xf32>, vector<8x8xf32> -> vector<8x32xf32>
    %78 = arith.truncf %77 : vector<8x32xf32> to vector<8x32xbf16>
    %c0_18 = arith.constant 0 : index
    %c0_19 = arith.constant 0 : index
    %79 = vector.load %arg9[%c0_18, %c0_19] : memref<32x32xbf16, #tpu.memory_space<vmem>>, vector<32x32xbf16>
    %cst_20 = arith.constant dense<0.000000e+00> : vector<8x32xf32>
    %80 = tpu.matmul %78, %79, %cst_20 {dimension_numbers = #tpu.dot_dimension_numbers<[1], [0], [0], [1], [0, 0, 1, 1], [], []>} : vector<8x32xbf16>, vector<32x32xbf16>, vector<8x32xf32> -> vector<8x32xf32>
    %c0_21 = arith.constant 0 : index
    %c0_22 = arith.constant 0 : index
    %81 = vector.load %arg10[%c0_21, %c0_22] : memref<1x32xf32, #tpu.memory_space<vmem>>, vector<1x32xf32>
    %82 = vector.broadcast %81 : vector<1x32xf32> to vector<8x32xf32>
    %83 = arith.addf %80, %82 : vector<8x32xf32>
    %84 = arith.truncf %83 : vector<8x32xf32> to vector<8x32xbf16>
    %c0_23 = arith.constant 0 : index
    %c0_24 = arith.constant 0 : index
    %85 = vector.load %arg11[%c0_23, %c0_24] : memref<32x128xbf16, #tpu.memory_space<vmem>>, vector<32x128xbf16>
    %cst_25 = arith.constant dense<0.000000e+00> : vector<8x128xf32>
    %86 = tpu.matmul %84, %85, %cst_25 {dimension_numbers = #tpu.dot_dimension_numbers<[1], [0], [0], [1], [0, 0, 1, 1], [], []>} : vector<8x32xbf16>, vector<32x128xbf16>, vector<8x128xf32> -> vector<8x128xf32>
    %c0_26 = arith.constant 0 : index
    %c0_27 = arith.constant 0 : index
    %87 = vector.load %arg12[%c0_26, %c0_27] : memref<1x128xf32, #tpu.memory_space<vmem>>, vector<1x128xf32>
    %88 = vector.broadcast %87 : vector<1x128xf32> to vector<8x128xf32>
    %89 = arith.addf %86, %88 : vector<8x128xf32>
    %90 = arith.negf %89 : vector<8x128xf32>
    %91 = math.exp %90 : vector<8x128xf32>
    %cst_28 = arith.constant 1.000000e+00 : f32
    %92 = vector.broadcast %cst_28 : f32 to vector<8x128xf32>
    %93 = arith.addf %92, %91 : vector<8x128xf32>
    %94 = arith.divf %92, %93 : vector<8x128xf32>
    %95 = arith.mulf %89, %94 : vector<8x128xf32>
    %96 = arith.truncf %95 : vector<8x128xf32> to vector<8x128xbf16>
    %c0_29 = arith.constant 0 : index
    %c0_30 = arith.constant 0 : index
    %97 = vector.load %arg13[%c0_29, %c0_30] : memref<128x128xbf16, #tpu.memory_space<vmem>>, vector<128x128xbf16>
    %cst_31 = arith.constant dense<0.000000e+00> : vector<8x128xf32>
    %98 = tpu.matmul %96, %97, %cst_31 {dimension_numbers = #tpu.dot_dimension_numbers<[1], [0], [0], [1], [0, 0, 1, 1], [], []>} : vector<8x128xbf16>, vector<128x128xbf16>, vector<8x128xf32> -> vector<8x128xf32>
    %c0_32 = arith.constant 0 : index
    %c0_33 = arith.constant 0 : index
    %99 = vector.load %arg14[%c0_32, %c0_33] : memref<1x128xf32, #tpu.memory_space<vmem>>, vector<1x128xf32>
    %100 = vector.broadcast %99 : vector<1x128xf32> to vector<8x128xf32>
    %101 = arith.addf %98, %100 : vector<8x128xf32>
    %102 = arith.truncf %101 : vector<8x128xf32> to vector<8x128xbf16>
    %c0_34 = arith.constant 0 : index
    %c0_35 = arith.constant 0 : index
    %c0_36 = arith.constant 0 : index
    %103 = vector.load %arg15[%c0_34, %c0_35, %c0_36] : memref<1x8x128xbf16, #tpu.memory_space<vmem>>, vector<1x8x128xbf16>
    %104 = vector.shape_cast %103 : vector<1x8x128xbf16> to vector<8x128xbf16>
    %105 = vector.shape_cast %102 : vector<8x128xbf16> to vector<1x8x128xbf16>
    tpu.vector_store %arg15[%c0_34, %c0_35, %c0_36], %105 {strides = array<i32>} : memref<1x8x128xbf16, #tpu.memory_space<vmem>>, vector<1x8x128xbf16>,
    return
  }
  func.func @transform_0(%arg0: i32, %arg1: i32) -> (i32, i32, i32) {
    %c0_i32 = arith.constant 0 : i32
    %c0_i32_0 = arith.constant 0 : i32
    %c0_i32_1 = arith.constant 0 : i32
    return %arg0, %c0_i32, %c0_i32_0 : i32, i32, i32
  }
  func.func @transform_1(%arg0: i32, %arg1: i32) -> (i32, i32) {
    %c0_i32 = arith.constant 0 : i32
    %c0_i32_0 = arith.constant 0 : i32
    %c0_i32_1 = arith.constant 0 : i32
    return %c0_i32, %c0_i32_0 : i32, i32
  }
  func.func @transform_2(%arg0: i32, %arg1: i32) -> (i32, i32) {
    %c0_i32 = arith.constant 0 : i32
    %c0_i32_0 = arith.constant 0 : i32
    %c0_i32_1 = arith.constant 0 : i32
    return %c0_i32, %c0_i32_0 : i32, i32
  }
  func.func @transform_3(%arg0: i32, %arg1: i32) -> (i32, i32) {
    %c0_i32 = arith.constant 0 : i32
    %c0_i32_0 = arith.constant 0 : i32
    %c0_i32_1 = arith.constant 0 : i32
    return %c0_i32, %c0_i32_0 : i32, i32
  }
  func.func @transform_4(%arg0: i32, %arg1: i32) -> (i32, i32) {
    %c0_i32 = arith.constant 0 : i32
    %c0_i32_0 = arith.constant 0 : i32
    %c0_i32_1 = arith.constant 0 : i32
    return %c0_i32, %c0_i32_0 : i32, i32
  }
  func.func @transform_5(%arg0: i32, %arg1: i32) -> (i32, i32) {
    %c0_i32 = arith.constant 0 : i32
    %c0_i32_0 = arith.constant 0 : i32
    %c0_i32_1 = arith.constant 0 : i32
    return %c0_i32, %c0_i32_0 : i32, i32
  }
  func.func @transform_6(%arg0: i32, %arg1: i32) -> (i32, i32) {
    %c0_i32 = arith.constant 0 : i32
    %c0_i32_0 = arith.constant 0 : i32
    %c0_i32_1 = arith.constant 0 : i32
    return %c0_i32, %c0_i32_0 : i32, i32
  }
  func.func @transform_7(%arg0: i32, %arg1: i32) -> (i32, i32) {
    %c0_i32 = arith.constant 0 : i32
    %c0_i32_0 = arith.constant 0 : i32
    %c0_i32_1 = arith.constant 0 : i32
    return %c0_i32, %c0_i32_0 : i32, i32
  }
  func.func @transform_8(%arg0: i32, %arg1: i32) -> (i32, i32) {
    %c0_i32 = arith.constant 0 : i32
    %c0_i32_0 = arith.constant 0 : i32
    %c0_i32_1 = arith.constant 0 : i32
    return %c0_i32, %c0_i32_0 : i32, i32
  }
  func.func @transform_9(%arg0: i32, %arg1: i32) -> (i32, i32) {
    %c0_i32 = arith.constant 0 : i32
    %c0_i32_0 = arith.constant 0 : i32
    %c0_i32_1 = arith.constant 0 : i32
    return %c0_i32, %c0_i32_0 : i32, i32
  }
  func.func @transform_10(%arg0: i32, %arg1: i32) -> (i32, i32) {
    %c0_i32 = arith.constant 0 : i32
    %c0_i32_0 = arith.constant 0 : i32
    %c0_i32_1 = arith.constant 0 : i32
    return %c0_i32, %c0_i32_0 : i32, i32
  }
  func.func @transform_11(%arg0: i32, %arg1: i32) -> (i32, i32) {
    %c0_i32 = arith.constant 0 : i32
    %c0_i32_0 = arith.constant 0 : i32
    %c0_i32_1 = arith.constant 0 : i32
    return %c0_i32, %c0_i32_0 : i32, i32
  }
  func.func @transform_12(%arg0: i32, %arg1: i32) -> (i32, i32) {
    %c0_i32 = arith.constant 0 : i32
    %c0_i32_0 = arith.constant 0 : i32
    %c0_i32_1 = arith.constant 0 : i32
    return %c0_i32, %c0_i32_0 : i32, i32
  }
  func.func @transform_13(%arg0: i32, %arg1: i32) -> (i32, i32, i32) {
    %c0_i32 = arith.constant 0 : i32
    %c0_i32_0 = arith.constant 0 : i32
    return %arg0, %arg1, %c0_i32 : i32, i32, i32
  }
}

</mosaic_0001>

<bundles_post_ra>
// kernel: tpu_custom_call.1
= control target key start
LH: loop header
LB: loop body
LE: loop exit
PB: predicated region body
PF: predicated region fallthrough
CT: control target
= control target key end

     0   :  { %s3390_s0 = inlined_call_operand.hbm [shape: bf16[2,8,32], index: 0, kind: input, shape index: {}]   ;;  %s3391_s1 = inlined_call_operand.hbm [shape: f32[8,8], index: 1, kind: input, shape index: {}]   ;;  %s3392_s2 = inlined_call_operand.hbm [shape: f32[8,8], index: 2, kind: input, shape index: {}]   ;;  %s3393_s3 = inlined_call_operand.hbm [shape: bf16[32,32], index: 3, kind: input, shape index: {}]   ;;  %s3394_s4 = inlined_call_operand.hbm [shape: f32[1,32], index: 4, kind: input, shape index: {}]   ;;  %s3395_s5 = inlined_call_operand.hbm [shape: bf16[32,32], index: 5, kind: input, shape index: {}]   ;;  %s3396_s6 = inlined_call_operand.hbm [shape: f32[1,32], index: 6, kind: input, shape index: {}]   ;;  %s3397_s7 = inlined_call_operand.hbm [shape: bf16[32,32], index: 7, kind: input, shape index: {}]   ;;  %s3398_s8 = inlined_call_operand.hbm [shape: f32[1,32], index: 8, kind: input, shape index: {}]   ;;  %s3399_s9 = inlined_call_operand.hbm [shape: bf16[32,128], index: 9, kind: input, shape index: {}]   ;;  %s3400_s10 = inlined_call_operand.hbm [shape: f32[1,128], index: 10, kind: input, shape index: {}]   ;;  %s3401_s11 = inlined_call_operand.hbm [shape: bf16[128,128], index: 11, kind: input, shape index: {}]   ;;  %s3402_s12 = inlined_call_operand.hbm [shape: f32[1,128], index: 12, kind: input, shape index: {}]   ;;  %s3403_s13 = inlined_call_operand.hbm [shape: bf16[2,8,128], index: 13, kind: output, shape index: {}]  }
   0x1   :  { %3414 = sst [smem:[#allocation38_spill]] %s3390_s0 }
   0x2   :  { %3415 = sst [smem:[#allocation39_spill]] %s3391_s1 }
   0x3   :  { %3416 = sst [smem:[#allocation40_spill]] %s3392_s2 }
   0x4   :  { %3417 = sst [smem:[#allocation41_spill]] %s3393_s3 }
   0x5   :  { %3418 = sst [smem:[#allocation42_spill]] %s3403_s13 }
   0x6   :  { %18 = vsyncpa [#allocation5], 0 }
   0x7   :  { %20 = vsyncpa [#allocation5 + $0x1], 0 }
   0x8   :  { %21 = vsyncpa [#allocation8], 0 }
   0x9   :  { %22 = vsyncpa [#allocation11], 0 }
   0xa   :  { %23 = vsyncpa [#allocation14], 0 }
   0xb   :  { %24 = vsyncpa [#allocation17], 0 }
   0xc   :  { %25 = vsyncpa [#allocation20], 0 }
   0xd   :  { %26 = vsyncpa [#allocation23], 0 }
   0xe   :  { %27 = vsyncpa [#allocation6], 0 }
   0xf   :  { %29 = vsyncpa [#allocation6 + $0x1], 0  ;;  %s2720_s25 = smov 0   ;;  %s2722_s26 = smov 0  }
  0x10   :  { %s2724_s27 = smov 0   ;;  %s2726_s28 = smov 0  }
  0x11   :  { %s2728_s29 = smov 0   ;;  %s2730_s30 = smov 0  }
  0x12 LB: > { %3419 = sst [smem:[#allocation34_spill]] %s2579_s25  ;;  %s3404_s14 = sadd.s32 4294967295, %s2599_s30   ;;  %s2599_s30 = sphi %s2730_s30, %s35_s30   ;;  %s2595_s29 = sphi %s2728_s29, %s3466_s29   ;;  %s2591_s28 = sphi %s2726_s28, %s3465_s28   ;;  %s2587_s27 = sphi %s2724_s27, %s3464_s27   ;;  %s2583_s26 = sphi %s2722_s26, %s3463_s26   ;;  %s2579_s25 = sphi %s2720_s25, %s3462_s25  }
  0x13   : > { %3420 = sst [smem:[#allocation35_spill]] %s2591_s28  ;;  %p1669_p0 = scmp.ge.s32.totalorder %s2599_s30, 1 }
  0x14   : > { %p2754_p1 = scmp.eq.s32.totalorder %s3404_s14, 0  ;;  %p358_p2 = scmp.lt.s32.totalorder %s2599_s30, 3 }
  0x15   : > { %s2621_s17 = smov [#allocation7]   ;;  %s2622_s19 = smov [#allocation10]  }
  0x16   : > { %s3421_s15 = scalar_select %p2754_p1, 1, 0 }
  0x17   : > { %p2759_p3 = pnand %p1669_p0, %p358_p2  ;;  %s371_s18 = sshll.u32 %s2621_s17, 4  ;;  %s372_s18 = int_to_ptr.vmem [resolvable:$true] %s371_s18 }
  0x18   : > { %3422 = sst [smem:[#allocation36_spill]] %s3421_s15  ;;  %s392_s20 = sshll.u32 %s2622_s19, 4  ;;  %s2772_s20 = int_to_ptr.vmem [resolvable:$true] %s392_s20 }
  0x19   : > { %s3423_s16 = scalar_select %p2759_p3, 1, 0 }
  0x1a   : > { %p1885_p5 = pneg %p2759_p3  ;;  %s2623_s22 = smov [#allocation13]  }
  0x1b   : > { %3424 = sst [smem:[#allocation37_spill]] %s3423_s16  ;;  %s2774_s23 = sshll.u32 %s2623_s22, 4  ;;  %s417_s23 = int_to_ptr.vmem [resolvable:$true] %s2774_s23 }
  0x1c   : > { %p2768_p6 = pnand %p1885_p5, %p2754_p1  ;;  %s3426_s1 = sld [smem:[#allocation39_spill]] }
  0x1e   : > { %p2784_p8 = pneg %p2768_p6 }
  0x22   : > { %s2107_s17 = scalar_lea.hbm %s3426_s1, 128 }
  0x23   : > { %p2108_p7 = scmp.ne.s32.totalorder %s3426_s1, %s2107_s17  ;;  %p2114_p11 = scmp.lt.u32.totalorder %s2107_s17, %s3426_s1 }
  0x25   : > { %p2110_p9 = pnand %p2784_p8, %p2108_p7 }
  0x27   : > { %p2111_p10 = pneg %p2110_p9 }
  0x29   : > { %p2116_p12 = pnand %p2114_p11, %p2111_p10 }
  0x2b   : > { %2119 = shalt.err (!%p2116_p12)
}
  0x2c   : > { %s2120_s14 = scalar_lea.vmem %s372_s18, 128  ;;  %p2128_p5 = scmp.lt.s32.totalorder %s372_s18, %s372_s18 }
  0x2d   : > { %p2121_p13 = scmp.ne.s32.totalorder %s372_s18, %s2120_s14  ;;  %p2129_p4 = scmp.lt.s32.totalorder %s2120_s14, %s2120_s14 }
  0x2f   : > { %p2123_p0 = pnand %p2121_p13, %p2784_p8  ;;  %p2130_p3 = por %p2129_p4, %p2128_p5 }
  0x31   : > { %p2124_p2 = pneg %p2123_p0 }
  0x33   : > { %p2131_p1 = pnand %p2130_p3, %p2124_p2 }
  0x35   : > { %2134 = shalt.err (!%p2131_p1)
}
  0x36   : > { %1888 = dma.hbm_to_vmem [thread:$0]  (!%p2768_p6), %s3426_s1, 128, %s372_s18, [#allocation8]  }
  0x37   : > { %s3428_s3 = sld [smem:[#allocation41_spill]] }
  0x3d   : > { %s2135_s17 = scalar_lea.hbm %s3428_s3, 256 }
  0x3e   : > { %p2136_p7 = scmp.ne.s32.totalorder %s3428_s3, %s2135_s17  ;;  %p2142_p1 = scmp.lt.u32.totalorder %s2135_s17, %s3428_s3 }
  0x40   : > { %p2138_p9 = pnand %p2136_p7, %p2784_p8 }
  0x42   : > { %p2139_p4 = pneg %p2138_p9 }
  0x44   : > { %p2144_p3 = pnand %p2142_p1, %p2139_p4 }
  0x46   : > { %2147 = shalt.err (!%p2144_p3)
}
  0x47   : > { %s2148_s18 = scalar_lea.vmem %s2772_s20, 256  ;;  %p2156_p13 = scmp.lt.s32.totalorder %s2772_s20, %s2772_s20 }
  0x48   : > { %p2149_p10 = scmp.ne.s32.totalorder %s2772_s20, %s2148_s18  ;;  %p2157_p0 = scmp.lt.s32.totalorder %s2148_s18, %s2148_s18 }
  0x4a   : > { %p2151_p11 = pnand %p2149_p10, %p2784_p8  ;;  %p2158_p2 = por %p2157_p0, %p2156_p13 }
  0x4c   : > { %p2152_p12 = pneg %p2151_p11 }
  0x4e   : > { %p2159_p5 = pnand %p2158_p2, %p2152_p12 }
  0x50   : > { %2162 = shalt.err (!%p2159_p5)
}
  0x51   : > { %s2624_s0 = smov 64   ;;  %s2625_s15 = smov 4  }
  0x52   : > { %1894 = dma.hbm_to_vmem [thread:$0]  (!%p2768_p6), %s3428_s3, 256, %s2772_s20, [#allocation11], %s2624_s0, %s2624_s0, %s2625_s15  }
  0x53   : > { %s2163_s17 = scalar_lea.hbm %s3395_s5, 256 }
  0x54   : > { %p2164_p7 = scmp.ne.s32.totalorder %s3395_s5, %s2163_s17  ;;  %p2170_p1 = scmp.lt.u32.totalorder %s2163_s17, %s3395_s5 }
  0x56   : > { %p2166_p9 = pnand %p2164_p7, %p2784_p8 }
  0x58   : > { %p2167_p4 = pneg %p2166_p9 }
  0x5a   : > { %p2172_p3 = pnand %p2170_p1, %p2167_p4 }
  0x5c   : > { %2175 = shalt.err (!%p2172_p3)
}
  0x5d   : > { %s2176_s13 = scalar_lea.vmem %s417_s23, 256  ;;  %p2184_p13 = scmp.lt.s32.totalorder %s417_s23, %s417_s23 }
  0x5e   : > { %p2177_p10 = scmp.ne.s32.totalorder %s417_s23, %s2176_s13  ;;  %p2185_p0 = scmp.lt.s32.totalorder %s2176_s13, %s2176_s13 }
  0x60   : > { %p2179_p11 = pnand %p2177_p10, %p2784_p8  ;;  %p2186_p2 = por %p2185_p0, %p2184_p13 }
  0x62   : > { %p2180_p12 = pneg %p2179_p11 }
  0x64   : > { %p2187_p5 = pnand %p2186_p2, %p2180_p12 }
  0x66   : > { %2190 = shalt.err (!%p2187_p5)
}
  0x67   : > { %1900 = dma.hbm_to_vmem [thread:$0]  (!%p2768_p6), %s3395_s5, 256, %s417_s23, [#allocation14], %s2624_s0, %s2624_s0, %s2625_s15  }
  0x68   : > { %s2626_s28 = smov [#allocation16]   ;;  %s2627_s24 = smov [#allocation19]  }
  0x69   : > { %s440_s16 = sshll.u32 %s2626_s28, 4  ;;  %s464_s17 = sshll.u32 %s2627_s24, 4  ;;  %s441_s16 = int_to_ptr.vmem [resolvable:$true] %s440_s16  ;;  %s465_s17 = int_to_ptr.vmem [resolvable:$true] %s464_s17 }
  0x6a   : > { %s2191_s18 = scalar_lea.hbm %s3397_s7, 256 }
  0x6b   : > { %p2192_p7 = scmp.ne.s32.totalorder %s3397_s7, %s2191_s18  ;;  %p2198_p1 = scmp.lt.u32.totalorder %s2191_s18, %s3397_s7 }
  0x6d   : > { %p2194_p9 = pnand %p2192_p7, %p2784_p8 }
  0x6f   : > { %p2195_p4 = pneg %p2194_p9 }
  0x71   : > { %p2200_p3 = pnand %p2198_p1, %p2195_p4 }
  0x73   : > { %2203 = shalt.err (!%p2200_p3)
}
  0x74   : > { %s2204_s23 = scalar_lea.vmem %s441_s16, 256  ;;  %p2212_p13 = scmp.lt.s32.totalorder %s441_s16, %s441_s16 }
  0x75   : > { %p2205_p10 = scmp.ne.s32.totalorder %s441_s16, %s2204_s23  ;;  %p2213_p0 = scmp.lt.s32.totalorder %s2204_s23, %s2204_s23 }
  0x77   : > { %p2207_p11 = pnand %p2205_p10, %p2784_p8  ;;  %p2214_p2 = por %p2213_p0, %p2212_p13 }
  0x79   : > { %p2208_p12 = pneg %p2207_p11 }
  0x7b   : > { %p2215_p5 = pnand %p2214_p2, %p2208_p12 }
  0x7d   : > { %2218 = shalt.err (!%p2215_p5)
}
  0x7e   : > { %1906 = dma.hbm_to_vmem [thread:$0]  (!%p2768_p6), %s3397_s7, 256, %s441_s16, [#allocation17], %s2624_s0, %s2624_s0, %s2625_s15  }
  0x7f   : > { %s2219_s24 = scalar_lea.hbm %s3399_s9, 256 }
  0x80   : > { %p2220_p7 = scmp.ne.s32.totalorder %s3399_s9, %s2219_s24  ;;  %p2226_p1 = scmp.lt.u32.totalorder %s2219_s24, %s3399_s9 }
  0x82   : > { %p2222_p9 = pnand %p2220_p7, %p2784_p8 }
  0x84   : > { %p2223_p4 = pneg %p2222_p9 }
  0x86   : > { %p2228_p3 = pnand %p2226_p1, %p2223_p4 }
  0x88   : > { %2231 = shalt.err (!%p2228_p3)
}
  0x89   : > { %s2232_s1 = scalar_lea.vmem %s465_s17, 256  ;;  %p2240_p13 = scmp.lt.s32.totalorder %s465_s17, %s465_s17 }
  0x8a   : > { %p2233_p10 = scmp.ne.s32.totalorder %s465_s17, %s2232_s1  ;;  %p2241_p0 = scmp.lt.s32.totalorder %s2232_s1, %s2232_s1 }
  0x8c   : > { %p2235_p11 = pnand %p2233_p10, %p2784_p8  ;;  %p2242_p2 = por %p2241_p0, %p2240_p13 }
  0x8e   : > { %p2236_p12 = pneg %p2235_p11 }
  0x90   : > { %p2243_p5 = pnand %p2242_p2, %p2236_p12 }
  0x92   : > { %2246 = shalt.err (!%p2243_p5)
}
  0x93   : > { %1912 = dma.hbm_to_vmem [thread:$0]  (!%p2768_p6), %s3399_s9, 256, %s465_s17, [#allocation20], %s2624_s0, %s2624_s0, %s2625_s15  }
  0x94   : > { %s2628_s3 = smov [#allocation22]   ;;  %s2629_s20 = smov [#allocation9]  }
  0x95   : > { %s488_s25 = sshll.u32 %s2628_s3, 4  ;;  %s382_s28 = sshll.u32 %s2629_s20, 4  ;;  %s489_s25 = int_to_ptr.vmem [resolvable:$true] %s488_s25  ;;  %s383_s28 = int_to_ptr.vmem [resolvable:$true] %s382_s28 }
  0x96   : > { %s2247_s14 = scalar_lea.hbm %s3401_s11, 1024 }
  0x97   : > { %p2248_p7 = scmp.ne.s32.totalorder %s3401_s11, %s2247_s14  ;;  %p2254_p1 = scmp.lt.u32.totalorder %s2247_s14, %s3401_s11 }
  0x99   : > { %p2250_p9 = pnand %p2248_p7, %p2784_p8 }
  0x9b   : > { %p2251_p4 = pneg %p2250_p9 }
  0x9d   : > { %p2256_p3 = pnand %p2254_p1, %p2251_p4 }
  0x9f   : > { %2259 = shalt.err (!%p2256_p3)
}
  0xa0   : > { %s2260_s17 = scalar_lea.vmem %s489_s25, 1024  ;;  %p2268_p13 = scmp.lt.s32.totalorder %s489_s25, %s489_s25 }
  0xa1   : > { %p2261_p10 = scmp.ne.s32.totalorder %s489_s25, %s2260_s17  ;;  %p2269_p0 = scmp.lt.s32.totalorder %s2260_s17, %s2260_s17 }
  0xa3   : > { %p2263_p11 = pnand %p2261_p10, %p2784_p8  ;;  %p2270_p2 = por %p2269_p0, %p2268_p13 }
  0xa5   : > { %p2264_p12 = pneg %p2263_p11 }
  0xa7   : > { %p2271_p5 = pnand %p2270_p2, %p2264_p12 }
  0xa9   : > { %2274 = shalt.err (!%p2271_p5)
}
  0xaa   : > { %1918 = dma.hbm_to_vmem [thread:$0]  (!%p2768_p6), %s3401_s11, 1024, %s489_s25, [#allocation23], %s2624_s0, %s2624_s0, %s2625_s15  }
  0xab   : > { %s3429_s2 = sld [smem:[#allocation40_spill]] }
  0xb1   : > { %s2275_s22 = scalar_lea.hbm %s3429_s2, 128 }
  0xb2   : > { %p2276_p7 = scmp.ne.s32.totalorder %s3429_s2, %s2275_s22  ;;  %p2282_p1 = scmp.lt.u32.totalorder %s2275_s22, %s3429_s2 }
  0xb4   : > { %p2278_p9 = pnand %p2276_p7, %p2784_p8 }
  0xb6   : > { %p2279_p4 = pneg %p2278_p9 }
  0xb8   : > { %p2284_p3 = pnand %p2282_p1, %p2279_p4 }
  0xba   : > { %2287 = shalt.err (!%p2284_p3)
}
  0xbb   : > { %s2288_s16 = scalar_lea.vmem %s383_s28, 128  ;;  %p2296_p13 = scmp.lt.s32.totalorder %s383_s28, %s383_s28 }
  0xbc   : > { %p2289_p10 = scmp.ne.s32.totalorder %s383_s28, %s2288_s16  ;;  %p2297_p0 = scmp.lt.s32.totalorder %s2288_s16, %s2288_s16 }
  0xbe   : > { %p2291_p11 = pnand %p2289_p10, %p2784_p8  ;;  %p2298_p2 = por %p2297_p0, %p2296_p13 }
  0xc0   : > { %p2292_p12 = pneg %p2291_p11 }
  0xc2   : > { %p2299_p5 = pnand %p2298_p2, %p2292_p12 }
  0xc4   : > { %2302 = shalt.err (!%p2299_p5)
}
  0xc5   : > { %1891 = dma.hbm_to_vmem [thread:$0]  (!%p2768_p6), %s3429_s2, 128, %s383_s28, [#allocation8]  }
  0xc6   : > { %s2630_s25 = smov [#allocation12]   ;;  %s2631_s23 = smov [#allocation15]  }
  0xc7   : > { %s406_s17 = sshll.u32 %s2630_s25, 4  ;;  %s430_s3 = sshll.u32 %s2631_s23, 4  ;;  %s407_s17 = int_to_ptr.vmem [resolvable:$true] %s406_s17  ;;  %s431_s3 = int_to_ptr.vmem [resolvable:$true] %s430_s3 }
  0xc8   : > { %s2303_s22 = scalar_lea.hbm %s3394_s4, 16 }
  0xc9   : > { %p2304_p7 = scmp.ne.s32.totalorder %s3394_s4, %s2303_s22  ;;  %p2310_p1 = scmp.lt.u32.totalorder %s2303_s22, %s3394_s4 }
  0xcb   : > { %p2306_p9 = pnand %p2304_p7, %p2784_p8 }
  0xcd   : > { %p2307_p4 = pneg %p2306_p9 }
  0xcf   : > { %p2312_p3 = pnand %p2310_p1, %p2307_p4 }
  0xd1   : > { %2315 = shalt.err (!%p2312_p3)
}
  0xd2   : > { %s2316_s28 = scalar_lea.vmem %s407_s17, 16  ;;  %s2323_s16 = scalar_lea.vmem %s407_s17, 32 }
  0xd3   : > { %p2317_p10 = scmp.ne.s32.totalorder %s407_s17, %s2316_s28  ;;  %p2324_p13 = scmp.lt.s32.totalorder %s407_s17, %s407_s17 }
  0xd4   : > { %p2325_p0 = scmp.lt.s32.totalorder %s2323_s16, %s2316_s28 }
  0xd5   : > { %p2319_p11 = pnand %p2317_p10, %p2784_p8 }
  0xd6   : > { %p2326_p2 = por %p2325_p0, %p2324_p13 }
  0xd7   : > { %p2320_p12 = pneg %p2319_p11 }
  0xd9   : > { %p2327_p5 = pnand %p2326_p2, %p2320_p12 }
  0xdb   : > { %2330 = shalt.err (!%p2327_p5)
}
  0xdc   : > { %1897 = dma.hbm_to_vmem [thread:$0]  (!%p2768_p6), %s3394_s4, 16, %s407_s17, [#allocation11]  }
  0xdd   : > { %s2331_s20 = scalar_lea.hbm %s3396_s6, 16 }
  0xde   : > { %p2332_p7 = scmp.ne.s32.totalorder %s3396_s6, %s2331_s20  ;;  %p2338_p1 = scmp.lt.u32.totalorder %s2331_s20, %s3396_s6 }
  0xe0   : > { %p2334_p9 = pnand %p2332_p7, %p2784_p8 }
  0xe2   : > { %p2335_p4 = pneg %p2334_p9 }
  0xe4   : > { %p2340_p3 = pnand %p2338_p1, %p2335_p4 }
  0xe6   : > { %2343 = shalt.err (!%p2340_p3)
}
  0xe7   : > { %s2344_s13 = scalar_lea.vmem %s431_s3, 16  ;;  %s2351_s17 = scalar_lea.vmem %s431_s3, 32 }
  0xe8   : > { %p2345_p10 = scmp.ne.s32.totalorder %s431_s3, %s2344_s13  ;;  %p2352_p13 = scmp.lt.s32.totalorder %s431_s3, %s431_s3 }
  0xe9   : > { %p2353_p0 = scmp.lt.s32.totalorder %s2351_s17, %s2344_s13 }
  0xea   : > { %p2347_p11 = pnand %p2345_p10, %p2784_p8 }
  0xeb   : > { %p2354_p2 = por %p2353_p0, %p2352_p13 }
  0xec   : > { %p2348_p12 = pneg %p2347_p11 }
  0xee   : > { %p2355_p5 = pnand %p2354_p2, %p2348_p12 }
  0xf0   : > { %2358 = shalt.err (!%p2355_p5)
}
  0xf1   : > { %1903 = dma.hbm_to_vmem [thread:$0]  (!%p2768_p6), %s3396_s6, 16, %s431_s3, [#allocation14]  }
  0xf2   : > { %s2632_s16 = smov [#allocation18]   ;;  %s2633_s15 = smov [#allocation21]  }
  0xf3   : > { %s454_s0 = sshll.u32 %s2632_s16, 4  ;;  %s478_s25 = sshll.u32 %s2633_s15, 4  ;;  %s455_s0 = int_to_ptr.vmem [resolvable:$true] %s454_s0  ;;  %s479_s25 = int_to_ptr.vmem [resolvable:$true] %s478_s25 }
  0xf4   : > { %s2359_s24 = scalar_lea.hbm %s3398_s8, 16 }
  0xf5   : > { %p2360_p7 = scmp.ne.s32.totalorder %s3398_s8, %s2359_s24  ;;  %p2366_p1 = scmp.lt.u32.totalorder %s2359_s24, %s3398_s8 }
  0xf7   : > { %p2362_p9 = pnand %p2360_p7, %p2784_p8 }
  0xf9   : > { %p2363_p4 = pneg %p2362_p9 }
  0xfb   : > { %p2368_p3 = pnand %p2366_p1, %p2363_p4 }
  0xfd   : > { %2371 = shalt.err (!%p2368_p3)
}
  0xfe   : > { %s2372_s3 = scalar_lea.vmem %s455_s0, 16  ;;  %s2379_s17 = scalar_lea.vmem %s455_s0, 32 }
  0xff   : > { %p2373_p10 = scmp.ne.s32.totalorder %s455_s0, %s2372_s3  ;;  %p2380_p13 = scmp.lt.s32.totalorder %s455_s0, %s455_s0 }
 0x100   : > { %p2381_p0 = scmp.lt.s32.totalorder %s2379_s17, %s2372_s3 }
 0x101   : > { %p2375_p11 = pnand %p2373_p10, %p2784_p8 }
 0x102   : > { %p2382_p2 = por %p2381_p0, %p2380_p13 }
 0x103   : > { %p2376_p12 = pneg %p2375_p11 }
 0x105   : > { %p2383_p5 = pnand %p2382_p2, %p2376_p12 }
 0x107   : > { %2386 = shalt.err (!%p2383_p5)
}
 0x108   : > { %1909 = dma.hbm_to_vmem [thread:$0]  (!%p2768_p6), %s3398_s8, 16, %s455_s0, [#allocation17]  }
 0x109   : > { %s2387_s23 = scalar_lea.hbm %s3400_s10, 16 }
 0x10a   : > { %p2388_p7 = scmp.ne.s32.totalorder %s3400_s10, %s2387_s23  ;;  %p2394_p1 = scmp.lt.u32.totalorder %s2387_s23, %s3400_s10 }
 0x10c   : > { %p2390_p9 = pnand %p2388_p7, %p2784_p8 }
 0x10e   : > { %p2391_p4 = pneg %p2390_p9 }
 0x110   : > { %p2396_p3 = pnand %p2394_p1, %p2391_p4 }
 0x112   : > { %2399 = shalt.err (!%p2396_p3)
}
 0x113   : > { %s2400_s18 = scalar_lea.vmem %s479_s25, 16  ;;  %s2407_s0 = scalar_lea.vmem %s479_s25, 32 }
 0x114   : > { %p2401_p10 = scmp.ne.s32.totalorder %s479_s25, %s2400_s18  ;;  %p2408_p13 = scmp.lt.s32.totalorder %s479_s25, %s479_s25 }
 0x115   : > { %p2409_p0 = scmp.lt.s32.totalorder %s2407_s0, %s2400_s18 }
 0x116   : > { %p2403_p11 = pnand %p2401_p10, %p2784_p8 }
 0x117   : > { %p2410_p2 = por %p2409_p0, %p2408_p13 }
 0x118   : > { %p2404_p12 = pneg %p2403_p11 }
 0x11a   : > { %p2411_p5 = pnand %p2410_p2, %p2404_p12 }
 0x11c   : > { %2414 = shalt.err (!%p2411_p5)
}
 0x11d   : > { %1915 = dma.hbm_to_vmem [thread:$0]  (!%p2768_p6), %s3400_s10, 16, %s479_s25, [#allocation20]  }
 0x11e   : > { %s2634_s17 = smov [#allocation24]   ;;  %s2415_s15 = scalar_lea.hbm %s3402_s12, 16 }
 0x11f   : > { %s502_s1 = sshll.u32 %s2634_s17, 4  ;;  %p2416_p7 = scmp.ne.s32.totalorder %s3402_s12, %s2415_s15  ;;  %s503_s1 = int_to_ptr.vmem [resolvable:$true] %s502_s1 }
 0x120   : > { %p2422_p1 = scmp.lt.u32.totalorder %s2415_s15, %s3402_s12 }
 0x121   : > { %p2418_p9 = pnand %p2416_p7, %p2784_p8 }
 0x123   : > { %p2419_p4 = pneg %p2418_p9 }
 0x125   : > { %p2424_p3 = pnand %p2422_p1, %p2419_p4 }
 0x127   : > { %2427 = shalt.err (!%p2424_p3)
}
 0x128   : > { %s2428_s25 = scalar_lea.vmem %s503_s1, 16  ;;  %s2435_s14 = scalar_lea.vmem %s503_s1, 32 }
 0x129   : > { %p2429_p10 = scmp.ne.s32.totalorder %s503_s1, %s2428_s25  ;;  %p2436_p13 = scmp.lt.s32.totalorder %s503_s1, %s503_s1 }
 0x12a   : > { %p2437_p0 = scmp.lt.s32.totalorder %s2435_s14, %s2428_s25 }
 0x12b   : > { %p2431_p11 = pnand %p2429_p10, %p2784_p8 }
 0x12c   : > { %p2438_p2 = por %p2437_p0, %p2436_p13 }
 0x12d   : > { %p2432_p12 = pneg %p2431_p11 }
 0x12f   : > { %p2439_p5 = pnand %p2438_p2, %p2432_p12 }
 0x131   : > { %2442 = shalt.err (!%p2439_p5)
}
 0x132   : > { %s3430_s19 = sld [smem:[#allocation34_spill]]  ;;  %s3431_s13 = sld [smem:[#allocation36_spill]] }
 0x133   : > { %1921 = dma.hbm_to_vmem [thread:$0]  (!%p2768_p6), %s3402_s12, 16, %s503_s1, [#allocation23]  }
 0x134   : > { %s1668_s3 = sadd.s32 4294967294, %s2599_s30   ;;  %s47_s17 = sadd.s32 1, %s2595_s29 }
 0x135   : > { %p49_p8 = scmp.ge.s32.totalorder %s47_s17, 2  ;;  %s54_s21 = sadd.s32 1, %s2587_s27 }
 0x136   : > { %p61_p7 = scmp.ne.s32.totalorder %s2587_s27, %s2583_s26  ;;  %p62_p9 = scmp.eq.s32.totalorder %s2599_s30, 0 }
 0x137   : > { %s3468_s17 = smov (%p49_p8, %s47_s17), 0  ;;  %s3433_s16 = sadd.s32 4294967295, %s2599_s30  }
 0x138   : > { %p3027_p4 = por %p62_p9, %p61_p7  ;;  %p67_p1 = scmp.ne.s32.totalorder %s2583_s26, %s3430_s19 }
 0x139   : > { %s51_s1 = ssub.s32 %s2595_s29, %s3468_s17  ;;  %p345_p6 = scmp.eq.s32.totalorder %s3433_s16, 1 }
 0x13a   : > { %p52_p3 = scmp.eq.s32.totalorder %s51_s1, 0  ;;  %p3434_p10 = scmp.ne.s32.totalorder %s3431_s13, 0 }
 0x13b   : > { %p3043_p12 = por %p345_p6, %p61_p7  ;;  %p351_p13 = scmp.eq.s32.totalorder %s1668_s3, 1 }
 0x13c   : > { %p3039_p11 = por %p3434_p10, %p67_p1  ;;  %p1942_p2 = scmp.lt.s32.totalorder %s2599_s30, 2 }
 0x13d   : > { %s3436_s23 = scalar_select %p3043_p12, 1, 0 }
 0x13e   : > { %s3048_s20 = scalar_select %p52_p3, %s2587_s27, %s54_s21  }
 0x13f   : > { %p3050_p0 = por %p351_p13, %p67_p1  ;;  %s513_s22 = sand.u32 1, %s2587_s27  }
 0x140   : > { %s1684_s25 = sshll.u32 %s2595_s29, 6  ;;  %s1683_s14 = sshll.u32 %s513_s22, 2 }
 0x141   : > { %s3437_s24 = scalar_select %p3050_p0, 1, 0 }
 0x142   : > { %s3438_s19 = sld [smem:[#allocation38_spill]]  ;;  %s517_s3 = scalar_lea.vmem [#allocation4], %s1683_s14 }
 0x143   : > { %s524_s21 = sshll.u32 %s517_s3, 4  ;;  %p3064_p5 = pnand %p1942_p2, %p3027_p4  ;;  %s3068_s21 = int_to_ptr.vmem [resolvable:$true] %s524_s21 }
 0x144   : > { %s514_s16 = scalar_lea.sflag [#allocation5], %s513_s22 }
 0x145   : > { %p2445_p7 = pneg %p3064_p5 }
 0x148   : > { %s3060_s13 = scalar_lea.hbm %s3438_s19, %s1684_s25  ;;  %s2448_s28 = scalar_lea.hbm %s3438_s19, 128 }
 0x149   : > { %s2443_s2 = scalar_lea.hbm %s3060_s13, 64  ;;  %p2449_p4 = scmp.lt.u32.totalorder %s3060_s13, %s3438_s19 }
 0x14a   : > { %p2444_p8 = scmp.ne.s32.totalorder %s3060_s13, %s2443_s2  ;;  %p2450_p6 = scmp.lt.u32.totalorder %s2448_s28, %s2443_s2 }
 0x14b   : > { %p2452_p10 = scmp.lt.u32.totalorder %s2443_s2, %s3060_s13 }
 0x14c   : > { %p2446_p9 = pnand %p2445_p7, %p2444_p8  ;;  %p2451_p3 = por %p2450_p6, %p2449_p4 }
 0x14e   : > { %p2447_p1 = pneg %p2446_p9  ;;  %p2453_p13 = por %p2452_p10, %p2451_p3 }
 0x150   : > { %p2454_p2 = pnand %p2453_p13, %p2447_p1 }
 0x152   : > { %2457 = shalt.err (!%p2454_p2)
}
 0x153   : > { %s2458_s22 = scalar_lea.vmem %s3068_s21, 64  ;;  %s2635_s3 = smov [#allocation4]  }
 0x154   : > { %p2459_p8 = scmp.ne.s32.totalorder %s3068_s21, %s2458_s22  ;;  %s2463_s25 = sshll.u32 %s2635_s3, 4  ;;  %s2464_s25 = int_to_ptr.vmem [resolvable:$false] %s2463_s25 }
 0x155   : > { %s2465_s14 = scalar_lea.vmem %s2464_s25, 128  ;;  %p2466_p12 = scmp.lt.s32.totalorder %s3068_s21, %s2464_s25 }
 0x156   : > { %p2461_p9 = pnand %p2459_p8, %p2445_p7  ;;  %p2467_p4 = scmp.lt.s32.totalorder %s2465_s14, %s2458_s22 }
 0x158   : > { %p2462_p0 = pneg %p2461_p9  ;;  %p2468_p6 = por %p2467_p4, %p2466_p12 }
 0x15a   : > { %p2469_p3 = pnand %p2468_p6, %p2462_p0 }
 0x15c   : > { %2472 = shalt.err (!%p2469_p3)
}
 0x15d   : > { %1925 = dma.hbm_to_vmem [thread:$0]  (!%p3064_p5), %s3060_s13, 64, %s3068_s21, %s514_s16  }
 0x15e   : > { %s3440_s2 = sld [smem:[#allocation37_spill]] }
 0x164   : > { %p3441_p1 = scmp.ne.s32.totalorder %s3440_s2, 0 }
 0x165   : > { %s3098_s28 = sand.u32 (!%p3441_p1), 1, %s2583_s26  }
 0x166   : > { %533 = sbr.rel (%p3441_p1) target bundleno = 2398 (0x95e), region = 72  ;;  %s1686_s18 = sshll.u32 (!%p3441_p1), %s3098_s28, 2 }
 0x167   : > { %s536_s0 = scalar_lea.sflag (!%p3441_p1), [#allocation5], %s3098_s28  ;;  %s3104_s22 = scalar_lea.vmem (!%p3441_p1), [#allocation4], %s1686_s18 }
 0x16d   : > { %2546 = dma.done.wait (%p3039_p11), %s536_s0, 64  }
 0x16e   : > { %2548 = vsyncadd (%p3039_p11), %s536_s0, 4294967232  ;;  %s3442_s13 = sld [smem:[#allocation36_spill]] }
 0x174   : > { %p3443_p12 = scmp.ne.s32.totalorder %s3442_s13, 0 }
 0x176   : > { %2550 = dma.done.wait (%p3443_p12), [#allocation8], 256  }
 0x177   : > { %2552 = vsyncadd (%p3443_p12), [#allocation8], 4294967040 }
 0x178   : > { %2554 = dma.done.wait (%p3443_p12), [#allocation11], 272  }
 0x179   : > { %2556 = vsyncadd (%p3443_p12), [#allocation11], 4294967024 }
 0x17a   : > { %2558 = dma.done.wait (%p3443_p12), [#allocation14], 272  }
 0x17b   : > { %2560 = vsyncadd (%p3443_p12), [#allocation14], 4294967024 }
 0x17c   : > { %2562 = dma.done.wait (%p3443_p12), [#allocation17], 272  }
 0x17d   : > { %2564 = vsyncadd (%p3443_p12), [#allocation17], 4294967024 }
 0x17e   : > { %2566 = dma.done.wait (%p3443_p12), [#allocation20], 272  }
 0x17f   : > { %2568 = vsyncadd (%p3443_p12), [#allocation20], 4294967024 }
 0x180   : > { %2570 = dma.done.wait (%p3443_p12), [#allocation23], 1040  }
 0x181   : > { %2572 = vsyncadd (%p3443_p12), [#allocation23], 4294966256  ;;  %v2636_v0 = vmov 0.0   ;;  %vm2637_vm0 = vmmov 0   ;;  %v2071_v1 = vld [vmem:[#allocation13] sm:$0xff]   ;;  %v2072_v2 = vld [vmem:[#allocation10] sm:$0xff]   ;;  %v907_v38 = vlaneseq }
 0x182   : > { %1767 = vmatprep.subr.bf16.mxu0 %v2636_v0  ;;  %1775 = vmatprep.subr.bf16.mxu1 %v2636_v0  ;;  %v2073_v3 = vld [vmem:[#allocation13 + $0x8] sm:$0xff]   ;;  %v2074_v4 = vld [vmem:[#allocation10 + $0x8] sm:$0xff]   ;;  %vm661_vm1 = vcmask 261120   ;;  %v1700_v7 = vld [vmem:[#allocation15] ss:$0 sm:$0xff]  ;;  %s2638_s15 = smov 124  }
 0x183   : > { %1771 = vmatprep.mubr.msk.bf16.mxu0 %vm2637_vm0, %v2636_v0  ;;  %1779 = vmatprep.mubr.msk.bf16.mxu1 %vm2637_vm0, %v2636_v0  ;;  %v635_v5 = vld [vmem:[%s3104_s22] sm:$0xf]  ;;  %v1706_v8 = vld [vmem:[#allocation12] ss:$0 sm:$0xff]  ;;  %s2639_s21 = smov 116   ;;  %s2640_s1 = smov 108  }
 0x184   : > { %1768 = vmatpush3.bf16.msra.mxu0 %v2071_v1  ;;  %1776 = vmatpush3.bf16.msra.mxu1 %v2072_v2  ;;  %v762_v6 = vld [vmem:[%s3104_s22] sm:$0xf]  ;;  %s2641_s16 = smov 100   ;;  %v3156_v19 = vld [vmem:[#allocation7] sm:$0xff]  ;;  %s2642_s3 = smov 8   ;;  %vm713_vm2 = vcmask 31744  }
 0x185   : > { %1769 = vmatprep.subr.bf16.mxu0 %v2636_v0  ;;  %1777 = vmatprep.subr.bf16.mxu1 %v2636_v0  ;;  %s2643_s25 = smov 16   ;;  %s2644_s14 = smov 24   ;;  %v3170_v22 = vld [vmem:[#allocation9] sm:$0xff]  ;;  %v908_v39 = vshrl.u32 %v907_v38, 7  ;;  %v961_v49 = vand.u32 127, %v907_v38  ;;  %vm718_vm7 = vcmask 60416  }
 0x186   : > { %s2645_s2 = smov 4   ;;  %s2646_s0 = smov 112  }
 0x187   : > { %v909_v40 = vadd.s32 8, %v908_v39  ;;  %v910_v41 = vadd.s32 16, %v908_v39  ;;  %v911_v42 = vadd.s32 24, %v908_v39  ;;  %v916_v45 = vand.u32 7, %v908_v39  ;;  %s2647_s22 = smov 120   ;;  %s2648_s13 = smov 104  }
 0x188   : > { %1770 = vmatpush3.bf16.msra.mxu0 %v2073_v3  ;;  %1778 = vmatpush3.bf16.msra.mxu1 %v2074_v4 }
 0x189   : > { %v923_v46 = vand.u32 7, %v909_v40  ;;  %v930_v47 = vand.u32 7, %v910_v41  ;;  %v937_v48 = vand.u32 7, %v911_v42  ;;  %vm3192_vm3 = vcmp.gt.s32.totalorder %v961_v49, %v916_v45 }
 0x18b   : > { %1772 = vmatmul.mubr.msk.bf16.vlgmr.msra.gmra.mrb[0].mxu0 %vm661_vm1, %v635_v5  ;;  %1780 = vmatmul.mubr.msk.bf16.vlgmr.msra.gmra.mrb[0].mxu1 %vm661_vm1, %v762_v6  ;;  %vm3196_vm4 = vcmp.gt.s32.totalorder %v961_v49, %v923_v46  ;;  %vm3200_vm5 = vcmp.gt.s32.totalorder %v961_v49, %v930_v47  ;;  %vm3204_vm6 = vcmp.gt.s32.totalorder %v961_v49, %v937_v48 }
 0x25e   : > { %v699_v9 = vpop.f32.mrb[0].mxu0  ;;  %v824_v11 = vpop.f32.mrb[0].mxu1 }
 0x25f   : > { %v3146_v10 = vadd.f32 %v1700_v7, %v699_v9  ;;  %v1773_v12 = vpop.f32.mrb[1].mxu0  ;;  %v3148_v13 = vadd.f32 %v1706_v8, %v824_v11  ;;  %v1781_v14 = vpop.f32.mrb[1].mxu1 }
 0x260   : > { %v702_v15 = vpop.f32.mrb[2].mxu0  ;;  %v827_v16 = vpop.f32.mrb[2].mxu1 }
 0x261   : > { %707 = vrot.lane.b32.xlu0 %v3146_v10, %s2638_s15  ;;  %v1774_v17 = vpop.f32.mrb[3].mxu0  ;;  %836 = vrot.lane.b32.xlu1 %v3148_v13, %s2638_s15  ;;  %v1782_v18 = vpop.f32.mrb[3].mxu1  ;;  %v1738_v35 = vpack.c.bf16 %v3146_v10, %v3146_v10  ;;  %v705_v6 = vmul.f32 %v3156_v19, %v3146_v10  ;;  %v834_v11 = vmul.f32 %v3156_v19, %v3148_v13  ;;  %s3240_s15 = scalar_lea.vmem [#allocation25], %s1686_s18 }
 0x265   : > { %733 = vrot.lane.b32.xlu0 %v3146_v10, %s2639_s21  ;;  %851 = vrot.lane.b32.xlu1 %v3148_v13, %s2639_s21  ;;  %s3250_s21 = smov 0  }
 0x269   : > { %865 = vrot.lane.b32.xlu0 %v3148_v13, %s2640_s1  ;;  %879 = vrot.lane.b32.xlu1 %v3148_v13, %s2641_s16 }
 0x26d   : > { %729 = vrot.lane.b32.xlu0 %v3156_v19, %s2642_s3  ;;  %847 = vrot.lane.b32.xlu1 %v3156_v19, %s2642_s3 }
 0x271   : > { %861 = vrot.lane.b32.xlu0 %v3156_v19, %s2643_s25  ;;  %875 = vrot.lane.b32.xlu1 %v3156_v19, %s2644_s14 }
 0x2d3   : > { %v3166_v20 = vpop.permute.xlu0 %707  ;;  %v3168_v21 = vpop.permute.xlu1 %836 }
 0x2d7   : > { %v734_v23 = vpop.permute.xlu0 %733  ;;  %v852_v24 = vpop.permute.xlu1 %851 }
 0x2d8   : > { %v736_v25 = vsel %vm713_vm2, %v734_v23, %v3166_v20  ;;  %v854_v26 = vsel %vm713_vm2, %v852_v24, %v3168_v21 }
 0x2d9   : > { %v737_v27 = vmul.f32 %v3170_v22, %v736_v25  ;;  %v855_v28 = vmul.f32 %v854_v26, %v3170_v22 }
 0x2db   : > { %739 = vrot.lane.b32.xlu0 %v737_v27, %s2642_s3  ;;  %v866_v29 = vpop.permute.xlu0 %865  ;;  %857 = vrot.lane.b32.xlu1 %v855_v28, %s2642_s3  ;;  %v880_v30 = vpop.permute.xlu1 %879  ;;  %v3242_v27 = vmov 0.0   ;;  %v3244_v28 = vmov 0.0  }
 0x2dc   : > { %v868_v31 = vsel %vm713_vm2, %v866_v29, %v852_v24  ;;  %v882_v33 = vsel %vm713_vm2, %v880_v30, %v866_v29  ;;  %v3246_v29 = vmov 0.0   ;;  %v3248_v30 = vmov 0.0  }
 0x2dd   : > { %v869_v32 = vmul.f32 %v868_v31, %v3170_v22  ;;  %v883_v34 = vmul.f32 %v882_v33, %v3170_v22 }
 0x2df   : > { %871 = vrot.lane.b32.xlu0 %v869_v32, %s2643_s25  ;;  %885 = vrot.lane.b32.xlu1 %v883_v34, %s2644_s14  ;;  %v730_v36 = vpop.permute.xlu0 %729  ;;  %v848_v37 = vpop.permute.xlu1 %847 }
 0x2e0   : > { %v850_v50 = vmul.f32 %v848_v37, %v3148_v13  ;;  %v732_v59 = vmul.f32 %v730_v36, %v3146_v10 }
 0x2e3   : > { %710 = vrot.lane.b32.xlu0 %v3146_v10, %s2645_s2  ;;  %839 = vrot.lane.b32.xlu1 %v3148_v13, %s2645_s2  ;;  %v862_v43 = vpop.permute.xlu0 %861  ;;  %v876_v44 = vpop.permute.xlu1 %875 }
 0x2e4   : > { %v864_v58 = vmul.f32 %v862_v43, %v3148_v13  ;;  %v878_v60 = vmul.f32 %v876_v44, %v3148_v13 }
 0x2e7   : > { %724 = vrot.lane.b32.xlu1 %v1738_v35, %s2646_s0 }
 0x34d   : > { %v740_v51 = vpop.permute.xlu0 %739  ;;  %v858_v56 = vpop.permute.xlu1 %857 }
 0x34e   : > { %v860_v57 = vadd.f32 %v858_v56, %v850_v50  ;;  %v742_v1 = vadd.f32 %v740_v51, %v732_v59 }
 0x350   : > { %890 = vrot.lane.b32.xlu0 %v860_v57, %s2647_s22  ;;  %v1739_v7 = vpack.c.bf16 %v742_v1, %v742_v1 }
 0x351   : > { %v872_v61 = vpop.permute.xlu0 %871  ;;  %v886_v62 = vpop.permute.xlu1 %885 }
 0x352   : > { %v874_v63 = vadd.f32 %v872_v61, %v864_v58  ;;  %v888_v2 = vadd.f32 %v886_v62, %v878_v60 }
 0x354   : > { %894 = vrot.lane.b32.xlu1 %v874_v63, %s2646_s0  ;;  %898 = vrot.lane.b32.xlu0 %v888_v2, %s2648_s13 }
 0x355   : > { %v711_v3 = vpop.permute.xlu0 %710  ;;  %v840_v4 = vpop.permute.xlu1 %839 }
 0x356   : > { %v714_v5 = vsel %vm713_vm2, %v3166_v20, %v711_v3  ;;  %v843_v8 = vsel %vm713_vm2, %v3168_v21, %v840_v4 }
 0x357   : > { %v715_v9 = vmul.f32 %v3170_v22, %v714_v5  ;;  %v844_v12 = vmul.f32 %v843_v8, %v3170_v22 }
 0x358   : > { %752 = vrot.lane.b32.xlu1 %v1738_v35, %s2648_s13  ;;  %747 = vrot.lane.b32.xlu0 %v1739_v7, %s2647_s22 }
 0x359   : > { %v716_v14 = vadd.f32 %v715_v9, %v705_v6  ;;  %v845_v15 = vadd.f32 %v844_v12, %v834_v11  ;;  %v725_v16 = vpop.permute.xlu1 %724 }
 0x35a   : > { %727 = vst.msk [vmem:[#allocation3] sm:$0xf] %vm718_vm7, %v725_v16 }
 0x35b   : > { %v717_v17 = vpack.c.bf16 %v716_v14, %v716_v14  ;;  %v3224_v18 = vmul.f32 0.35355338, %v845_v15 }
 0x35d   : > { %719 = vst.msk [vmem:[#allocation2] sm:$0xf] %vm718_vm7, %v717_v17 }
 0x3c2   : > { %v891_v10 = vpop.permute.xlu0 %890 }
 0x3c3   : > { %v3226_v20 = vmul.f32 0.35355338, %v891_v10 }
 0x3c5   : > { %v905_v13 = vpack.c.bf16 %v3226_v20, %v3224_v18 }
 0x3c6   : > { %v895_v19 = vpop.permute.xlu1 %894  ;;  %v899_v21 = vpop.permute.xlu0 %898 }
 0x3c7   : > { %v3230_v22 = vmul.f32 0.35355338, %v895_v19  ;;  %v3232_v23 = vmul.f32 0.35355338, %v899_v21 }
 0x3c9   : > { %v906_v24 = vpack.c.bf16 %v3232_v23, %v3230_v22 }
 0x3ca   : > { %v753_v25 = vpop.permute.xlu1 %752  ;;  %v748_v26 = vpop.permute.xlu0 %747 }
 0x3cb   : > { %756 = vst.msk [vmem:[#allocation3 + $0x4] sm:$0xf] %vm718_vm7, %v753_v25  ;;  %751 = vst.msk [vmem:[#allocation2 + $0x4] sm:$0xf] %vm718_vm7, %v748_v26 }
 0x3cc LB: >> { %vm987_vm8 = vcmask 64512   ;;  %s1710_s18 = sshll.u32 %s2619_s21, 2  ;;  %vm1094_vm9 = vcmask 1043456   ;;  %s976_s21 = sadd.s32 1, %s2619_s21   ;;  %s2619_s21 = sphi %s3250_s21, %s976_s21   ;;  %v2615_v30 = vphi %v3248_v30, %v3455_v30   ;;  %v2611_v29 = vphi %v3246_v29, %v3454_v29   ;;  %v2607_v28 = vphi %v3244_v28, %v3453_v28   ;;  %v2603_v27 = vphi %v3242_v27, %v3452_v27  }
 0x3cd   : >> { %1785 = vmatprep.mubr.msk.bf16.mxu0 %vm987_vm8, %v905_v13  ;;  %s982_s1 = scalar_lea.vmem [#allocation2], %s1710_s18  ;;  %s985_s16 = scalar_lea.vmem [#allocation3], %s1710_s18 }
 0x3ce   : >> { %p973_p11 = scmp.ge.s32.totalorder %s976_s21, 2  }
 0x3cf   : > { %vm1173_vm10 = vcmask (%p973_p11), 130048   ;;  %vm1175_vm11 = vcmask (%p973_p11), 195584   ;;  %v2093_v13 = vld [vmem:[#allocation19] sm:$0xff] (%p973_p11)   ;;  %v2094_v23 = vld [vmem:[#allocation19 + $0x8] sm:$0xff] (%p973_p11)   ;;  %s3457_s22 = sld [smem:[#allocation42_spill]] (%p973_p11)  ;;  %s1433_s21 = scalar_lea.sflag (%p973_p11), [#allocation6], %s3098_s28 }
 0x3d0   : > { %p3458_p5 = scmp.ne.s32.totalorder (%p973_p11), %s3436_s23, 0 }
 0x3d2   : >> { %v983_v31 = vld [vmem:[%s982_s1] sm:$0xf]  ;;  %s2649_s1 = smov (%p973_p11), [#allocation25]  }
 0x3d3   : >> { %1831 = vmatprep.subr.msk.bf16.mxu0 %vm987_vm8, %v983_v31  ;;  %v995_v32 = vsel %vm987_vm8, %v983_v31, 0  ;;  %v986_v45 = vld [vmem:[%s985_s16] sm:$0xf]  ;;  %s2477_s16 = sshll.u32 (%p973_p11), %s2649_s1, 4  ;;  %s2478_s16 = int_to_ptr.vmem [resolvable:$false] %s2477_s16 }
 0x3d4   : >> { %1784 = vmatpush3.bf16.xpose.msra.mxu0 %v995_v32  ;;  %1832 = vmatprep.subr.msk.bf16.mxu1 %vm1094_vm9, %v986_v45  ;;  %v1096_v46 = vsel %vm1094_vm9, %v986_v45, 0  ;;  %v2096_v45 = vld [vmem:[#allocation22 + $0x8] sm:$0xff] (%p973_p11)  }
 0x3d5   : >> { %1790 = vmatpush3.bf16.msra.mxu1 %v1096_v46  ;;  %1811 = vmatprep.subr.bf16.mxu0 (%p973_p11), %v2636_v0  ;;  %v2097_v46 = vld [vmem:[#allocation22 + $0x10] sm:$0xff] (%p973_p11)  }
 0x3d6   : > { %1795 = vmatprep.subr.bf16.mxu1 (%p973_p11), %v2636_v0 }
 0x3db   : >> { %1786 = vmatmul.mubr.msk.bf16.vlgmr.msra.gmra.mrb[0].mxu0 %vm987_vm8, %v906_v24  ;;  %v1716_v24 = vld [vmem:[#allocation18] ss:$0 sm:$0xff] (%p973_p11) }
 0x3dc   : > { %1827 = vmatprep.mubr.msk.bf16.mxu0 (%p973_p11), %vm2637_vm0, %v2636_v0 }
 0x4ae   : >> { %v1787_v33 = vpop.f32.mrb[0].mxu0 }
 0x4af   : >> { %v1048_v34 = vsel %vm3200_vm5, -inf, %v1787_v33  ;;  %v1031_v35 = vpop.f32.mrb[1].mxu0 }
 0x4b0   : >> { %v1046_v36 = vsel %vm3192_vm3, -inf, %v1031_v35  ;;  %v1788_v37 = vpop.f32.mrb[2].mxu0  ;;  %v1056_v38 = vsel %vm987_vm8, %v1048_v34, -inf }
 0x4b1   : >> { %v1049_v39 = vsel %vm3204_vm6, -inf, %v1788_v37  ;;  %1057 = vmax.xlane.f32.xlu1 %v1056_v38  ;;  %v1034_v40 = vpop.f32.mrb[3].mxu0  ;;  %v1050_v41 = vsel %vm987_vm8, %v1046_v36, -inf }
 0x4b2   : >> { %v1047_v42 = vsel %vm3196_vm4, -inf, %v1034_v40  ;;  %1051 = vmax.xlane.f32.xlu0 %v1050_v41  ;;  %v1059_v43 = vsel %vm987_vm8, %v1049_v39, -inf  ;;  %v2092_v40 = vld [vmem:[#allocation16 + $0x8] sm:$0xff] (%p973_p11)  }
 0x4b3   : >> { %v1053_v44 = vsel %vm987_vm8, %v1047_v42, -inf }
 0x4b5   : >> { %1060 = vmax.xlane.f32.xlu1 %v1059_v43 }
 0x4b6   : >> { %1054 = vmax.xlane.f32.xlu0 %v1053_v44  ;;  %v2095_v44 = vld [vmem:[#allocation22] sm:$0xff] (%p973_p11)  }
 0x4b7   : > { %1812 = vmatpush3.bf16.msra.mxu0 (%p973_p11), %v2095_v44 }
 0x4b8   : > { %1813 = vmatprep.subr.bf16.mxu0 (%p973_p11), %v2636_v0 }
 0x4bb   : > { %1814 = vmatpush3.bf16.msra.mxu0 (%p973_p11), %v2096_v45 }
 0x4bc   : > { %1815 = vmatprep.subr.bf16.mxu0 (%p973_p11), %v2636_v0 }
 0x4bf   : > { %1816 = vmatpush3.bf16.msra.mxu0 (%p973_p11), %v2097_v46 }
 0x4c0   : > { %1817 = vmatprep.subr.bf16.mxu0 (%p973_p11), %v2636_v0 }
 0x53e   : >> { %v1058_v47 = vpop.xlane.xlu1 %1057 }
 0x53f   : >> { %v1064_v48 = vsub.f32 %v1048_v34, %v1058_v47  ;;  %v1052_v49 = vpop.xlane.xlu0 %1051  ;;  %v2098_v47 = vld [vmem:[#allocation22 + $0x18] sm:$0xff] (%p973_p11)  }
 0x540   : >> { %v1062_v50 = vsub.f32 %v1046_v36, %v1052_v49  ;;  %1818 = vmatpush3.bf16.msra.mxu0 (%p973_p11), %v2098_v47  ;;  %v2100_v49 = vld [vmem:[#allocation22 + $0x28] sm:$0xff] (%p973_p11)  }
 0x541   : >> { %v1070_v51 = vmul.f32 1.442695, %v1064_v48  ;;  %1819 = vmatprep.subr.bf16.mxu0 (%p973_p11), %v2636_v0  ;;  %v2099_v48 = vld [vmem:[#allocation22 + $0x20] sm:$0xff] (%p973_p11)  }
 0x542   : >> { %v1066_v56 = vmul.f32 1.442695, %v1062_v50  ;;  %v1061_v57 = vpop.xlane.xlu1 %1060  ;;  %v2101_v50 = vld [vmem:[#allocation22 + $0x30] sm:$0xff] (%p973_p11)  }
 0x543   : >> { %v1065_v58 = vsub.f32 %v1049_v39, %v1061_v57  ;;  %v1055_v59 = vpop.xlane.xlu0 %1054 }
 0x544   : >> { %2075 = vpow2.f32 %v1066_v56  ;;  %v1063_v60 = vsub.f32 %v1047_v42, %v1055_v59  ;;  %1820 = vmatpush3.bf16.msra.mxu0 (%p973_p11), %v2099_v48  ;;  %v1720_v56 = vld [vmem:[#allocation21] ss:$0 sm:$0xff] (%p973_p11) }
 0x545   : >> { %v1072_v61 = vmul.f32 1.442695, %v1065_v58  ;;  %2077 = vpow2.f32 %v1070_v51  ;;  %1821 = vmatprep.subr.bf16.mxu0 (%p973_p11), %v2636_v0  ;;  %v2102_v51 = vld [vmem:[#allocation22 + $0x38] sm:$0xff] (%p973_p11)  }
 0x546   : >> { %v1068_v62 = vmul.f32 1.442695, %v1063_v60 }
 0x547   : >> { %2079 = vpow2.f32 %v1072_v61 }
 0x548   : >> { %2081 = vpow2.f32 %v1068_v62  ;;  %1822 = vmatpush3.bf16.msra.mxu0 (%p973_p11), %v2100_v49 }
 0x549   : > { %1823 = vmatprep.subr.bf16.mxu0 (%p973_p11), %v2636_v0 }
 0x54c   : > { %1824 = vmatpush3.bf16.msra.mxu0 (%p973_p11), %v2101_v50 }
 0x54d   : > { %1825 = vmatprep.subr.bf16.mxu0 (%p973_p11), %v2636_v0 }
 0x54e   : >> { %v2076_v63 = vpop.eup %2075 }
 0x54f   : >> { %v1074_v1 = vsel %vm987_vm8, %v2076_v63, 0.0  ;;  %v2078_v2 = vpop.eup %2077 }
 0x550   : >> { %1075 = vadd.xlane.f32.xlu0 %v1074_v1  ;;  %v1080_v5 = vsel %vm987_vm8, %v2078_v2, 0.0  ;;  %1826 = vmatpush3.bf16.msra.mxu0 (%p973_p11), %v2102_v51 }
 0x551   : >> { %v2080_v3 = vpop.eup %2079 }
 0x552   : >> { %v2082_v4 = vpop.eup %2081  ;;  %v1087_v8 = vpack.c.bf16 %v2080_v3, %v2078_v2  ;;  %v1083_v9 = vsel %vm987_vm8, %v2080_v3, 0.0 }
 0x553   : >> { %v1077_v6 = vsel %vm987_vm8, %v2082_v4, 0.0  ;;  %v1086_v7 = vpack.c.bf16 %v2082_v4, %v2076_v63  ;;  %v1725_v4 = vld [vmem:[#allocation24] ss:$0 sm:$0xff] (%p973_p11) }
 0x554   : >> { %1081 = vadd.xlane.f32.xlu0 %v1080_v5  ;;  %1078 = vadd.xlane.f32.xlu1 %v1077_v6 }
 0x555   : >> { %1791 = vmatprep.mubr.msk.bf16.mxu1 %vm987_vm8, %v1086_v7 }
 0x556   : >> { %1792 = vmatmul.mubr.msk.bf16.vlgmr.msra.gmra.mrb[0].mxu1 %vm987_vm8, %v1087_v8 }
 0x557   : > { %1799 = vmatprep.mubr.msk.bf16.mxu1 (%p973_p11), %vm2637_vm0, %v2636_v0 }
 0x558   : >> { %1084 = vadd.xlane.f32.xlu1 %v1083_v9 }
 0x5dd   : >> { %v1076_v11 = vpop.xlane.xlu0 %1075 }
 0x5e1   : >> { %v1079_v12 = vpop.xlane.xlu1 %1078  ;;  %v1082_v14 = vpop.xlane.xlu0 %1081 }
 0x5e2   : >> { %2083 = vrcp.f32 %v1082_v14 }
 0x5e3   : >> { %2085 = vrcp.f32 %v1076_v11 }
 0x5e5   : >> { %v1085_v15 = vpop.xlane.xlu1 %1084 }
 0x5e6   : >> { %2087 = vrcp.f32 %v1085_v15 }
 0x5e7   : >> { %2089 = vrcp.f32 %v1079_v12 }
 0x5ec   : >> { %v2084_v16 = vpop.eup %2083 }
 0x5ed   : >> { %v2086_v10 = vpop.eup %2085 }
 0x5f0   : >> { %v2088_v25 = vpop.eup %2087 }
 0x5f1   : >> { %v2090_v32 = vpop.eup %2089 }
 0x629   : >> { %v1793_v17 = vpop.f32.mrb[0].mxu1 }
 0x62a   : >> { %v1153_v19 = vmul.f32 %v2084_v16, %v1793_v17  ;;  %v1132_v21 = vpop.f32.mrb[1].mxu1 }
 0x62b   : >> { %v1151_v26 = vmul.f32 %v2086_v10, %v1132_v21  ;;  %v1794_v31 = vpop.f32.mrb[2].mxu1  ;;  %975 = sbr.rel (!%p973_p11) target bundleno = 972 (0x3cc), region = 183 }
 0x62c   : >> { %v1157_v33 = vadd.f32 %v2607_v28, %v1153_v19   ;;  %v1154_v34 = vmul.f32 %v2088_v25, %v1794_v31  ;;  %v1135_v35 = vpop.f32.mrb[3].mxu1 }
 0x62d   : >> { %v1155_v36 = vadd.f32 %v2615_v30, %v1151_v26   ;;  %v1152_v37 = vmul.f32 %v2090_v32, %v1135_v35 }
 0x62e   : >> { %v1158_v38 = vadd.f32 %v2603_v27, %v1154_v34   ;;  %v3453_v28 = vmov %v1157_v33 }
 0x62f   : >> { %v1156_v39 = vadd.f32 %v2611_v29, %v1152_v37   ;;  %v3455_v30 = vmov %v1155_v36 }
 0x630   : >> { %v3452_v27 = vmov %v1158_v38  ;;  %1168 = vrot.lane.b32.xlu1 (%p973_p11), %v1158_v38, %s2644_s14  ;;  %v2091_v30 = vld [vmem:[#allocation16] sm:$0xff] (%p973_p11)   ;;  %s1447_s14 = sshll.u32 (%p973_p11), %s3240_s15, 4  ;;  %s3342_s14 = int_to_ptr.vmem [resolvable:$true] %s1447_s14 }
 0x631   : >> { %v3454_v29 = vmov %v1156_v39  ;;  %1160 = vrot.lane.b32.xlu0 (%p973_p11), %v1156_v39, %s2642_s3  ;;  %1796 = vmatpush3.bf16.msra.mxu1 (%p973_p11), %v2091_v30  ;;  %s3456_s3 = sld [smem:[#allocation35_spill]] (%p973_p11)  ;;  %s2473_s18 = scalar_lea.vmem (%p973_p11), %s3342_s14, 64 }
 0x632   : > { %1797 = vmatprep.subr.bf16.mxu1 %v2636_v0  ;;  %p2474_p0 = scmp.ne.s32.totalorder %s3342_s14, %s2473_s18  ;;  %p2480_p13 = scmp.lt.s32.totalorder %s3342_s14, %s2478_s16 }
 0x634   : > { %p2475_p7 = pnand %p2474_p0, %p3458_p5 }
 0x635   : > { %1164 = vrot.lane.b32.xlu0 %v1157_v33, %s2643_s25  ;;  %1798 = vmatpush3.bf16.msra.mxu1 %v2092_v40 }
 0x636   : > { %1803 = vmatprep.subr.bf16.mxu1 %v2636_v0  ;;  %p2476_p10 = pneg %p2475_p7 }
 0x637   : > { %s1735_s25 = sshll.u32 %s3456_s3, 6  ;;  %s2479_s3 = scalar_lea.vmem %s2478_s16, 128 }
 0x638   : > { %s3340_s13 = scalar_lea.hbm %s3457_s22, %s1735_s25  ;;  %p2481_p2 = scmp.lt.s32.totalorder %s2479_s3, %s2473_s18 }
 0x63a   : > { %p2482_p8 = por %p2481_p2, %p2480_p13 }
 0x63c   : > { %p2483_p9 = pnand %p2482_p8, %p2476_p10 }
 0x6a2   : > { %v1169_v53 = vpop.permute.xlu1 %1168 }
 0x6a3   : > { %v1161_v52 = vpop.permute.xlu0 %1160 }
 0x6a4   : > { %v1172_v54 = vsel %vm987_vm8, %v1155_v36, %v1161_v52 }
 0x6a7   : > { %v1165_v55 = vpop.permute.xlu0 %1164 }
 0x6a8   : > { %v1174_v18 = vsel %vm1173_vm10, %v1172_v54, %v1165_v55 }
 0x6a9   : > { %v1176_v20 = vsel %vm1175_vm11, %v1174_v18, %v1169_v53 }
 0x6aa   : > { %v1177_v22 = vpack.c.bf16 %v1176_v20, %v1176_v20 }
 0x6ac   : > { %1800 = vmatmul.mubr.msk.bf16.vlgmr.msra.gmra.mrb[0].mxu1 %vm661_vm1, %v1177_v22 }
 0x6ad   : > { %1804 = vmatpush3.bf16.msra.mxu1 %v2093_v13  ;;  %1807 = vmatprep.mubr.msk.bf16.mxu1 %vm2637_vm0, %v2636_v0 }
 0x6ae   : > { %1805 = vmatprep.subr.bf16.mxu1 %v2636_v0 }
 0x6b1   : > { %1806 = vmatpush3.bf16.msra.mxu1 %v2094_v23 }
 0x77f   : > { %v1238_v27 = vpop.f32.mrb[0].mxu1 }
 0x780   : > { %v1239_v28 = vadd.f32 %v1716_v24, %v1238_v27  ;;  %v1801_v29 = vpop.f32.mrb[1].mxu1 }
 0x781   : > { %v1241_v41 = vpop.f32.mrb[2].mxu1 }
 0x782   : > { %v1244_v42 = vpack.c.bf16 %v1239_v28, %v1239_v28  ;;  %v1802_v43 = vpop.f32.mrb[3].mxu1 }
 0x784   : > { %1808 = vmatmul.mubr.msk.bf16.vlgmr.msra.gmra.mrb[4].mxu1 %vm661_vm1, %v1244_v42 }
 0x857   : > { %v1305_v57 = vpop.f32.mrb[4].mxu1 }
 0x858   : > { %v1306_v58 = vadd.f32 %v1720_v56, %v1305_v57  ;;  %v1809_v59 = vpop.f32.mrb[5].mxu1 }
 0x859   : > { %v1308_v60 = vpop.f32.mrb[6].mxu1 }
 0x85a   : > { %v1724_v61 = vmul.f32 -1.442695, %v1306_v58  ;;  %v1810_v62 = vpop.f32.mrb[7].mxu1 }
 0x85c   : > { %2103 = vpow2.f32 %v1724_v61 }
 0x866   : > { %v2104_v63 = vpop.eup %2103 }
 0x867   : > { %v1314_v1 = vadd.f32 1.0, %v2104_v63 }
 0x869   : > { %2105 = vrcp.f32 %v1314_v1 }
 0x873   : > { %v2106_v2 = vpop.eup %2105 }
 0x874   : > { %v1317_v3 = vmul.f32 %v2106_v2, %v1306_v58 }
 0x876   : > { %v1318_v0 = vpack.c.bf16 %v1317_v3, %v1317_v3 }
 0x878   : > { %1828 = vmatmul.mubr.bf16.vlgmr.msra.gmra.mrb[0].mxu0 %v1318_v0 }
 0x94b   : > { %v1424_v5 = vpop.f32.mrb[0].mxu0 }
 0x94c   : > { %v1425_v6 = vadd.f32 %v1725_v4, %v1424_v5  ;;  %v1829_v7 = vpop.f32.mrb[1].mxu0 }
 0x94d   : > { %v1427_v8 = vpop.f32.mrb[2].mxu0 }
 0x94e   : > { %v1430_v9 = vpack.c.bf16 %v1425_v6, %v1425_v6  ;;  %v1830_v11 = vpop.f32.mrb[3].mxu0 }
 0x950   : > { %1431 = vst [vmem:[%s3240_s15] sm:$0xf] %v1430_v9 }
 0x951   : > { %2486 = shalt.err (!%p2483_p9)
}
 0x952   : > { %s2487_s28 = scalar_lea.hbm %s3340_s13, 64  ;;  %s2491_s2 = scalar_lea.hbm %s3457_s22, 128 }
 0x953   : > { %p2488_p4 = scmp.ne.s32.totalorder %s3340_s13, %s2487_s28  ;;  %p2492_p1 = scmp.lt.u32.totalorder %s3340_s13, %s3457_s22 }
 0x954   : > { %p2493_p12 = scmp.lt.u32.totalorder %s2491_s2, %s2487_s28  ;;  %p2495_p0 = scmp.lt.u32.totalorder %s2487_s28, %s3340_s13 }
 0x955   : > { %p2489_p6 = pnand %p2488_p4, %p3458_p5 }
 0x956   : > { %p2494_p11 = por %p2493_p12, %p2492_p1 }
 0x957   : > { %p2490_p3 = pneg %p2489_p6 }
 0x958   : > { %p2496_p7 = por %p2495_p0, %p2494_p11 }
 0x95a   : > { %p2497_p10 = pnand %p2496_p7, %p2490_p3 }
 0x95c   : > { %2500 = shalt.err (!%p2497_p10)
}
 0x95d   : > { %1883 = dma.vmem_to_hbm [thread:$0]  (%p3458_p5), %s3342_s14, 64, %s3340_s13, %s1433_s21  }
 0x95e PF: > { %s3459_s18 = sld [smem:[#allocation34_spill]]  ;;  %p3460_p13 = scmp.ne.s32.totalorder %s3437_s24, 0 }
 0x95f   : > { %p3461_p2 = scmp.ge.s32.totalorder %s2599_s30, 2 }
 0x961   : > { %p1927_p8 = pnand %p3461_p2, %p3460_p13 }
 0x964   : > { %s1459_s16 = sand.u32 1, %s3459_s18  }
 0x965   : > { %s1460_s3 = scalar_lea.sflag [#allocation6], %s1459_s16 }
 0x966   : > { %2574 = dma.done.wait (!%p1927_p8), %s1460_s3, 64  }
 0x967   : > { %2576 = vsyncadd (!%p1927_p8), %s1460_s3, 4294967232  ;;  %s35_s30 = sadd.s32 1, %s2599_s30   ;;  %s3462_s25 = smov %s2583_s26 }
 0x968   : > { %p32_p9 = scmp.ge.s32.totalorder %s35_s30, 4   ;;  %s3463_s26 = smov %s2587_s27 }
 0x969   : > { %s3464_s27 = smov %s3048_s20  ;;  %s3465_s28 = smov %s2595_s29 }
 0x96a   : > { %s3466_s29 = smov %s3468_s17  ;;  %34 = sbr.rel (!%p32_p9) target bundleno = 18 (0x12), region = 194 }
 0x971   :  { %1465 = vsyncpa [#allocation5], 1 }
 0x972   :  { %1467 = vsyncpa [#allocation5 + $0x1], 1 }
 0x973   :  { %1468 = vsyncpa [#allocation8], 1 }
 0x974   :  { %1469 = vsyncpa [#allocation11], 1 }
 0x975   :  { %1470 = vsyncpa [#allocation14], 1 }
 0x976   :  { %1471 = vsyncpa [#allocation17], 1 }
 0x977   :  { %1472 = vsyncpa [#allocation20], 1 }
 0x978   :  { %1473 = vsyncpa [#allocation23], 1 }
 0x979   :  { %1474 = vsyncpa [#allocation6], 1 }
 0x97a   :  { %1476 = vsyncpa [#allocation6 + $0x1], 1 }

</bundles_post_ra>
